<compile_context>
chip_gen: v5e
topology: v5e:2x2
jax: 0.10.0
libtpu: 0.0.40
codegen_flags: <defaults>
</compile_context>

<pallas_src>
import functools

import jax
import jax.numpy as jnp
from jax.experimental import pallas as pl
from jax.experimental.pallas import tpu as pltpu


def _round_up(x, m):
    return ((x + m - 1) // m) * m


# ----------------------------------------------------------------------------
# Fused linear kernel: [LayerNorm] -> bf16 matmul (f32 acc) -> [bias] -> [residual]
# ----------------------------------------------------------------------------
def _linear_kernel(*refs, has_ln, has_bias, has_res, eps):
    x_ref, w_ref = refs[0], refs[1]
    o_ref = refs[-1]
    pos = 2
    x = x_ref[...].astype(jnp.float32)
    if has_ln:
        g = refs[pos][...]
        b = refs[pos + 1][...]
        pos += 2
        mu = jnp.mean(x, axis=-1, keepdims=True)
        var = jnp.mean(jnp.square(x - mu), axis=-1, keepdims=True)
        x = (x - mu) * jax.lax.rsqrt(var + eps) * g + b
    acc = jnp.dot(x.astype(jnp.bfloat16), w_ref[...],
                  preferred_element_type=jnp.float32)
    if has_bias:
        acc = acc + refs[pos][...]
        pos += 1
    if has_res:
        acc = acc + refs[pos][...]
        pos += 1
    o_ref[...] = acc


def pallas_linear(x2d, w, bias=None, ln=None, residual=None, tm=1024, eps=1e-5):
    """x2d: (M, K) f32; w: (K, N) bf16 -> (M, N) f32.  Optional fused LN prologue,
    bias add and residual add (one HBM pass instead of several)."""
    M, K = x2d.shape
    K2, N = w.shape
    assert K == K2
    tm = min(tm, _round_up(M, 8))
    Mp = _round_up(M, tm)
    x = x2d.astype(jnp.float32)
    if Mp != M:
        x = jnp.pad(x, ((0, Mp - M), (0, 0)))

    args = [x, w.astype(jnp.bfloat16)]
    in_specs = [pl.BlockSpec((tm, K), lambda i: (i, 0)),
                pl.BlockSpec((K, N), lambda i: (0, 0))]
    if ln is not None:
        g, b = ln
        args += [g.reshape(1, K).astype(jnp.float32),
                 b.reshape(1, K).astype(jnp.float32)]
        in_specs += [pl.BlockSpec((1, K), lambda i: (0, 0)),
                     pl.BlockSpec((1, K), lambda i: (0, 0))]
    if bias is not None:
        args.append(bias.reshape(1, N).astype(jnp.float32))
        in_specs.append(pl.BlockSpec((1, N), lambda i: (0, 0)))
    if residual is not None:
        r = residual.astype(jnp.float32)
        if Mp != M:
            r = jnp.pad(r, ((0, Mp - M), (0, 0)))
        args.append(r)
        in_specs.append(pl.BlockSpec((tm, N), lambda i: (i, 0)))

    out = pl.pallas_call(
        functools.partial(_linear_kernel, has_ln=ln is not None,
                          has_bias=bias is not None,
                          has_res=residual is not None, eps=eps),
        out_shape=jax.ShapeDtypeStruct((Mp, N), jnp.float32),
        grid_spec=pltpu.PrefetchScalarGridSpec(
            num_scalar_prefetch=0,
            grid=(Mp // tm,),
            in_specs=in_specs,
            out_specs=pl.BlockSpec((tm, N), lambda i: (i, 0)),
        ),
        compiler_params=pltpu.CompilerParams(dimension_semantics=("parallel",)),
    )(*args)
    return out[:M]


# ----------------------------------------------------------------------------
# Row-tiled LayerNorm (final ViT norm)
# ----------------------------------------------------------------------------
def _layernorm_kernel(x_ref, g_ref, b_ref, o_ref, *, eps):
    x = x_ref[...]
    mu = jnp.mean(x, axis=-1, keepdims=True)
    var = jnp.mean(jnp.square(x - mu), axis=-1, keepdims=True)
    o_ref[...] = (x - mu) * jax.lax.rsqrt(var + eps) * g_ref[...] + b_ref[...]


def pallas_layernorm(x2d, gamma, beta, tm=1024, eps=1e-5):
    M, C = x2d.shape
    tm = min(tm, _round_up(M, 8))
    Mp = _round_up(M, tm)
    x = x2d.astype(jnp.float32)
    if Mp != M:
        x = jnp.pad(x, ((0, Mp - M), (0, 0)))
    out = pl.pallas_call(
        functools.partial(_layernorm_kernel, eps=eps),
        out_shape=jax.ShapeDtypeStruct((Mp, C), jnp.float32),
        grid=(Mp // tm,),
        in_specs=[pl.BlockSpec((tm, C), lambda i: (i, 0)),
                  pl.BlockSpec((1, C), lambda i: (0, 0)),
                  pl.BlockSpec((1, C), lambda i: (0, 0))],
        out_specs=pl.BlockSpec((tm, C), lambda i: (i, 0)),
        compiler_params=pltpu.CompilerParams(dimension_semantics=("parallel",)),
    )(x, gamma.reshape(1, C).astype(jnp.float32),
      beta.reshape(1, C).astype(jnp.float32))
    return out[:M]


# ----------------------------------------------------------------------------
# Fused attention: QK^T * scale -> softmax -> PV, all heads of a batch per step
# ----------------------------------------------------------------------------
def _attention_kernel(q_ref, k_ref, v_ref, o_ref, *, scale):
    q, k, v = q_ref[0], k_ref[0], v_ref[0]                       # (nh, S, dh) bf16
    s = jnp.einsum('hqd,hkd->hqk', q, k,
                   preferred_element_type=jnp.float32) * scale
    m = jnp.max(s, axis=-1, keepdims=True)
    e = jnp.exp(s - m)
    p = e / jnp.sum(e, axis=-1, keepdims=True)
    o_ref[0] = jnp.einsum('hqk,hkd->hqd', p.astype(jnp.bfloat16), v,
                          preferred_element_type=jnp.float32)


def pallas_attention(q, k, v):
    """q, k, v: (B, nh, S, dh) -> (B, nh, S, dh) f32 (softmax(QK^T/sqrt(dh)) V)."""
    B, nh, S, dh = q.shape
    spec = pl.BlockSpec((1, nh, S, dh), lambda b: (b, 0, 0, 0))
    return pl.pallas_call(
        functools.partial(_attention_kernel, scale=dh ** -0.5),
        out_shape=jax.ShapeDtypeStruct((B, nh, S, dh), jnp.float32),
        grid=(B,),
        in_specs=[spec, spec, spec],
        out_specs=spec,
        compiler_params=pltpu.CompilerParams(dimension_semantics=("parallel",)),
    )(q.astype(jnp.bfloat16), k.astype(jnp.bfloat16), v.astype(jnp.bfloat16))


# ----------------------------------------------------------------------------
# Tap-accumulated 3x3x3 'same' conv (no bias), channels-last.
# The padded volume is flattened to (rows, Cin); each output row tile manually
# DMAs an overlapping window (tile + 2*margin rows) into VMEM once and then
# accumulates 27 static-offset (tm, Cin) @ (Cin, Cout) matmuls — no 27x im2col
# materialization in HBM.
# ----------------------------------------------------------------------------
def _conv3x3x3_kernel(x_hbm, w_ref, o_ref, win_ref, sem, *, tm, win_rows, tap_offs):
    i = pl.program_id(0)
    start = pl.multiple_of(i * tm, 8)
    cp = pltpu.make_async_copy(x_hbm.at[pl.ds(start, win_rows)], win_ref, sem.at[0])
    cp.start()
    cp.wait()
    cout = o_ref.shape[-1]
    acc = jnp.zeros((tm, cout), jnp.float32)
    for t, off in enumerate(tap_offs):
        acc = acc + jnp.dot(win_ref[pl.ds(off, tm), :], w_ref[t],
                            preferred_element_type=jnp.float32)
    o_ref[...] = acc


def conv3d_3x3(x, w, tm=2048):
    """x: (B, D, H, W, Cin) channels-last; w: (27, Cin, Cout) bf16 (taps dz,dy,dx-major)."""
    B, D, H, W, Cin = x.shape
    Cout = w.shape[-1]
    Dp, Hp, Wp = D + 2, H + 2, W + 2
    R = B * Dp * Hp * Wp
    margin = Hp * Wp + Wp + 1
    tm = min(tm, _round_up(R, 8))
    Rp = _round_up(R, tm)
    win_rows = tm + 2 * margin

    xp = jnp.pad(x.astype(jnp.bfloat16), ((0, 0), (1, 1), (1, 1), (1, 1), (0, 0)))
    flat = xp.reshape(R, Cin)
    flat = jnp.pad(flat, ((margin, (Rp - R) + margin), (0, 0)))   # guard rows

    tap_offs = tuple(dz * Hp * Wp + dy * Wp + dx
                     for dz in range(3) for dy in range(3) for dx in range(3))

    out = pl.pallas_call(
        functools.partial(_conv3x3x3_kernel, tm=tm, win_rows=win_rows,
                          tap_offs=tap_offs),
        out_shape=jax.ShapeDtypeStruct((Rp, Cout), jnp.float32),
        grid_spec=pltpu.PrefetchScalarGridSpec(
            num_scalar_prefetch=0,
            grid=(Rp // tm,),
            in_specs=[pl.BlockSpec(memory_space=pl.ANY),
                      pl.BlockSpec((27, Cin, Cout), lambda i: (0, 0, 0))],
            out_specs=pl.BlockSpec((tm, Cout), lambda i: (i, 0)),
            scratch_shapes=[pltpu.VMEM((win_rows, Cin), jnp.bfloat16),
                            pltpu.SemaphoreType.DMA((1,))],
        ),
        compiler_params=pltpu.CompilerParams(dimension_semantics=("arbitrary",)),
    )(flat, w.astype(jnp.bfloat16))
    out = out[:R].reshape(B, Dp, Hp, Wp, Cout)[:, 1:1 + D, 1:1 + H, 1:1 + W, :]
    return out


def conv3d_1x1(x, w, bias=None):
    """1x1x1 conv as a plain fused matmul; x: (B,D,H,W,Cin), w: (Cin, Cout) bf16."""
    B, D, H, W, Cin = x.shape
    Cout = w.shape[-1]
    out = pallas_linear(x.reshape(B * D * H * W, Cin), w, bias=bias)
    return out.reshape(B, D, H, W, Cout)


def conv_transpose3d_2x(x, w):
    """ConvTranspose3d kernel 2, stride 2, no bias.
    x: (B,D,H,W,Cin); w: (Cin, Cout*8) bf16 with columns ordered (cout, kd, kh, kw)."""
    B, D, H, W, Cin = x.shape
    Cout = w.shape[1] // 8
    out = pallas_linear(x.reshape(B * D * H * W, Cin), w)         # (BDHW, Cout*8)
    out = out.reshape(B, D, H, W, Cout, 2, 2, 2)
    # TODO(synk): this 2x2x2 interleave could be folded into the matmul output index_map.
    out = out.transpose(0, 1, 5, 2, 6, 3, 7, 4).reshape(B, 2 * D, 2 * H, 2 * W, Cout)
    return out


# ----------------------------------------------------------------------------
# InstanceNorm3d (affine=False) on channels-last, optionally fused with a residual
# add (optionally instance-normed itself) and LeakyReLU(0.01).
# ----------------------------------------------------------------------------
def _instance_norm_kernel(*refs, eps, has_res, norm_res, lrelu):
    a_ref = refs[0]
    o_ref = refs[-1]
    x = a_ref[...]                                                # (1, DHW, C) f32
    mu = jnp.mean(x, axis=1, keepdims=True)
    var = jnp.mean(jnp.square(x - mu), axis=1, keepdims=True)
    y = (x - mu) * jax.lax.rsqrt(var + eps)
    if has_res:
        r = refs[1][...]
        if norm_res:
            mr = jnp.mean(r, axis=1, keepdims=True)
            vr = jnp.mean(jnp.square(r - mr), axis=1, keepdims=True)
            r = (r - mr) * jax.lax.rsqrt(vr + eps)
        y = y + r
    if lrelu:
        y = jnp.where(y >= 0, y, 0.01 * y)
    o_ref[...] = y


def instance_norm(x, residual=None, norm_residual=False, lrelu=False, eps=1e-5):
    B, D, H, W, C = x.shape
    S = D * H * W
    spec = pl.BlockSpec((1, S, C), lambda b: (b, 0, 0))
    args = [x.reshape(B, S, C).astype(jnp.float32)]
    in_specs = [spec]
    if residual is not None:
        args.append(residual.reshape(B, S, C).astype(jnp.float32))
        in_specs.append(spec)
    # TODO(synk): at production volumes (96^3) this per-batch block must become a two-pass
    # (stats, then normalize) row-tiled kernel to stay inside v7x's 64 MiB VMEM.
    out = pl.pallas_call(
        functools.partial(_instance_norm_kernel, eps=eps,
                          has_res=residual is not None,
                          norm_res=norm_residual, lrelu=lrelu),
        out_shape=jax.ShapeDtypeStruct((B, S, C), jnp.float32),
        grid=(B,),
        in_specs=in_specs,
        out_specs=spec,
        compiler_params=pltpu.CompilerParams(dimension_semantics=("parallel",)),
    )(*args)
    return out.reshape(B, D, H, W, C)


# ----------------------------------------------------------------------------
# ViT (perceptron patch embedding + 12 transformer blocks + final LayerNorm)
# ----------------------------------------------------------------------------
def patch_embed(x, p, patch=16):
    B, D, H, W, C = x.shape
    gd, gh, gw = D // patch, H // patch, W // patch
    xr = x.reshape(B, gd, patch, gh, patch, gw, patch, C)
    xr = xr.transpose(0, 1, 3, 5, 2, 4, 6, 7).reshape(B * gd * gh * gw, patch ** 3 * C)
    tok = pallas_linear(xr, p['w'], bias=p['b']).reshape(B, gd * gh * gw, -1)
    return tok + p['pos']


def transformer_block(x, p, num_heads):
    B, S, Hd = x.shape
    dh = Hd // num_heads
    xf = x.reshape(B * S, Hd)
    # LayerNorm1 fused as the QKV matmul prologue (qkv has no bias, as in MONAI SABlock)
    qkv = pallas_linear(xf, p['qkv_w'], ln=(p['ln1_g'], p['ln1_b']))
    qkv = qkv.reshape(B, S, 3, num_heads, dh)
    q = qkv[:, :, 0].transpose(0, 2, 1, 3)
    k = qkv[:, :, 1].transpose(0, 2, 1, 3)
    v = qkv[:, :, 2].transpose(0, 2, 1, 3)
    ctx = pallas_attention(q, k, v)
    ctx = ctx.transpose(0, 2, 1, 3).reshape(B * S, Hd)
    # out-projection with the residual add fused into the matmul epilogue
    x1 = pallas_linear(ctx, p['proj_w'], bias=p['proj_b'], residual=xf)
    # LayerNorm2 fused into fc1
    h1 = pallas_linear(x1, p['fc1_w'], bias=p['fc1_b'], ln=(p['ln2_g'], p['ln2_b']))
    # TODO(synk): exact-erf GELU (nn.GELU()) kept in XLA rather than fused in-kernel.
    h1 = jax.nn.gelu(h1, approximate=False)
    x2 = pallas_linear(h1, p['fc2_w'], bias=p['fc2_b'], residual=x1)
    return x2.reshape(B, S, Hd)


def vit_forward(x, p, num_heads):
    tok = patch_embed(x, p['patch'])
    hidden_states = []
    for bp in p['blocks']:
        tok = transformer_block(tok, bp, num_heads)
        hidden_states.append(tok)
    B, S, Hd = tok.shape
    tok = pallas_layernorm(tok.reshape(B * S, Hd), p['norm_g'],
                           p['norm_b']).reshape(B, S, Hd)
    return tok, hidden_states


# ----------------------------------------------------------------------------
# UNETR decoder blocks (channels-last)
# ----------------------------------------------------------------------------
def unet_res_block(x, p):
    out = conv3d_3x3(x, p['conv1_w'])
    out = instance_norm(out, lrelu=True)
    out = conv3d_3x3(out, p['conv2_w'])
    if 'conv3_w' in p:
        res = conv3d_1x1(x, p['conv3_w'])
        return instance_norm(out, residual=res, norm_residual=True, lrelu=True)
    return instance_norm(out, residual=x, norm_residual=False, lrelu=True)


def pr_up_block(x, p):
    x = conv_transpose3d_2x(x, p['transp_init_w'])
    for blk in p['blocks']:
        x = conv_transpose3d_2x(x, blk['transp_w'])
        x = unet_res_block(x, blk['res'])
    return x


def up_block(x, skip, p):
    x = conv_transpose3d_2x(x, p['transp_w'])
    x = jnp.concatenate([x, skip], axis=-1)
    return unet_res_block(x, p['res'])


def proj_feat(tokens, feat_size):
    B = tokens.shape[0]
    return tokens.reshape(B, feat_size[0], feat_size[1], feat_size[2], -1)


def ssf_unetr_forward(x_in, params, cfg):
    feat, nh = cfg['feat_size'], cfg['num_heads']
    x_cl = x_in.transpose(0, 2, 3, 4, 1)                 # NCDHW -> NDHWC once
    tok, hs = vit_forward(x_cl, params['vit'], nh)
    enc1 = unet_res_block(x_cl, params['enc1'])
    enc2 = pr_up_block(proj_feat(hs[3], feat), params['enc2'])
    enc3 = pr_up_block(proj_feat(hs[6], feat), params['enc3'])
    enc4 = pr_up_block(proj_feat(hs[9], feat), params['enc4'])
    dec4 = proj_feat(tok, feat)
    dec3 = up_block(dec4, enc4, params['dec5'])
    dec2 = up_block(dec3, enc3, params['dec4'])
    dec1 = up_block(dec2, enc2, params['dec3'])
    out = up_block(dec1, enc1, params['dec2'])
    logits = conv3d_1x1(out, params['out']['w'], bias=params['out']['b'])
    return logits.transpose(0, 4, 1, 2, 3)               # NDHWC -> NCDHW once


# ----------------------------------------------------------------------------
# Deterministic parameter initialization (weights stored bf16 in kernel-ready layout)
# ----------------------------------------------------------------------------
class KeyGen:
    def __init__(self, seed):
        self.key = jax.random.PRNGKey(seed)

    def __call__(self):
        self.key, sub = jax.random.split(self.key)
        return sub


def _normal(kg, shape, std, dtype=jnp.float32):
    return (jax.random.normal(kg(), shape, jnp.float32) * std).astype(dtype)


def _conv3_w(kg, cin, cout):
    return _normal(kg, (27, cin, cout), (cin * 27) ** -0.5, jnp.bfloat16)


def _conv1_w(kg, cin, cout):
    return _normal(kg, (cin, cout), cin ** -0.5, jnp.bfloat16)


def _tconv_w(kg, cin, cout):
    return _normal(kg, (cin, cout * 8), (cin * 8) ** -0.5, jnp.bfloat16)


def _res_block_params(kg, cin, cout):
    p = {'conv1_w': _conv3_w(kg, cin, cout), 'conv2_w': _conv3_w(kg, cout, cout)}
    if cin != cout:
        p['conv3_w'] = _conv1_w(kg, cin, cout)
    return p


def init_params(seed, in_ch, out_ch, feature_size, hidden, mlp_dim, num_layers, n_patches):
    kg = KeyGen(seed)
    patch_dim = in_ch * 16 ** 3
    vit = {
        'patch': {'w': _normal(kg, (patch_dim, hidden), patch_dim ** -0.5, jnp.bfloat16),
                  'b': jnp.zeros((hidden,), jnp.float32),
                  'pos': _normal(kg, (1, n_patches, hidden), 0.02)},
        'blocks': [],
        'norm_g': jnp.ones((hidden,), jnp.float32),
        'norm_b': jnp.zeros((hidden,), jnp.float32),
    }
    for _ in range(num_layers):
        vit['blocks'].append({
            'ln1_g': jnp.ones((hidden,), jnp.float32), 'ln1_b': jnp.zeros((hidden,), jnp.float32),
            'qkv_w': _normal(kg, (hidden, hidden * 3), hidden ** -0.5, jnp.bfloat16),
            'proj_w': _normal(kg, (hidden, hidden), hidden ** -0.5, jnp.bfloat16),
            'proj_b': jnp.zeros((hidden,), jnp.float32),
            'ln2_g': jnp.ones((hidden,), jnp.float32), 'ln2_b': jnp.zeros((hidden,), jnp.float32),
            'fc1_w': _normal(kg, (hidden, mlp_dim), hidden ** -0.5, jnp.bfloat16),
            'fc1_b': jnp.zeros((mlp_dim,), jnp.float32),
            'fc2_w': _normal(kg, (mlp_dim, hidden), mlp_dim ** -0.5, jnp.bfloat16),
            'fc2_b': jnp.zeros((hidden,), jnp.float32),
        })

    fs = feature_size
    params = {
        'vit': vit,
        'enc1': _res_block_params(kg, in_ch, fs),
        'enc2': {'transp_init_w': _tconv_w(kg, hidden, fs * 2),
                 'blocks': [{'transp_w': _tconv_w(kg, fs * 2, fs * 2),
                             'res': _res_block_params(kg, fs * 2, fs * 2)} for _ in range(2)]},
        'enc3': {'transp_init_w': _tconv_w(kg, hidden, fs * 4),
                 'blocks': [{'transp_w': _tconv_w(kg, fs * 4, fs * 4),
                             'res': _res_block_params(kg, fs * 4, fs * 4)} for _ in range(1)]},
        'enc4': {'transp_init_w': _tconv_w(kg, hidden, fs * 8), 'blocks': []},
        'dec5': {'transp_w': _tconv_w(kg, hidden, fs * 8),
                 'res': _res_block_params(kg, fs * 16, fs * 8)},
        'dec4': {'transp_w': _tconv_w(kg, fs * 8, fs * 4),
                 'res': _res_block_params(kg, fs * 8, fs * 4)},
        'dec3': {'transp_w': _tconv_w(kg, fs * 4, fs * 2),
                 'res': _res_block_params(kg, fs * 4, fs * 2)},
        'dec2': {'transp_w': _tconv_w(kg, fs * 2, fs),
                 'res': _res_block_params(kg, fs * 2, fs)},
        'out': {'w': _conv1_w(kg, fs, out_ch), 'b': jnp.zeros((out_ch,), jnp.float32)},
    }
    return params


# ----------------------------------------------------------------------------
if __name__ == "__main__":
    # Patch size is fixed at 16^3 by the module, so the minimal interesting image
    # is 32^3 -> 2x2x2 = 8 tokens.
    B, in_channels, out_channels = 1, 2, 3
    img_size = (32, 32, 32)
    feature_size = 8
    hidden_size = 48
    mlp_dim = 96
    num_heads = 4            # hidden_size % num_heads == 0
    num_layers = 12          # hardcoded in SSF_UNETR
    feat_size = (img_size[0] // 16, img_size[1] // 16, img_size[2] // 16)
    n_patches = feat_size[0] * feat_size[1] * feat_size[2]

    x_in = jax.random.normal(jax.random.PRNGKey(0), (B, in_channels) + img_size, jnp.float32)
    params = init_params(1, in_channels, out_channels, feature_size, hidden_size,
                         mlp_dim, num_layers, n_patches)

    cfg = {'hidden_size': hidden_size, 'feat_size': feat_size, 'num_heads': num_heads}
    logits = ssf_unetr_forward(x_in, params, cfg)
    logits = jax.block_until_ready(logits)

    assert logits.shape == (B, out_channels) + img_size, logits.shape
    assert jnp.all(jnp.isfinite(logits))
    print("KERNEL_OK")
</pallas_src>

<mosaic_0001>
module attributes {stable_mosaic.version = 11 : i64} {
  func.func @_linear_kernel(%arg0: i32, %arg1: memref<8x8192xf32, #tpu.memory_space<vmem>>, %arg2: memref<8192x48xbf16, #tpu.memory_space<vmem>>, %arg3: memref<1x48xf32, #tpu.memory_space<vmem>>, %arg4: memref<8x48xf32, #tpu.memory_space<vmem>>) attributes {dimension_semantics = [#tpu.dimension_semantics<parallel>], iteration_bounds = array<i64: 1>, scalar_prefetch = 0 : i64, scratch_operands = 0 : i64, tpu.core_type = #tpu.core_type<tc>, window_params = [{transform_indices = @transform_0, window_bounds = array<i64: 8, 8192>}, {pipeline_mode = #tpu.pipeline_mode<synchronous>, transform_indices = @transform_1, window_bounds = array<i64: 8192, 48>}, {pipeline_mode = #tpu.pipeline_mode<synchronous>, transform_indices = @transform_2, window_bounds = array<i64: 1, 48>}, {transform_indices = @transform_3, window_bounds = array<i64: 8, 48>}]} {
    %c0 = arith.constant 0 : index
    %c0_0 = arith.constant 0 : index
    %0 = vector.load %arg1[%c0, %c0_0] : memref<8x8192xf32, #tpu.memory_space<vmem>>, vector<8x8192xf32>
    %1 = arith.truncf %0 : vector<8x8192xf32> to vector<8x8192xbf16>
    %c0_1 = arith.constant 0 : index
    %c0_2 = arith.constant 0 : index
    %2 = vector.load %arg2[%c0_1, %c0_2] : memref<8192x48xbf16, #tpu.memory_space<vmem>>, vector<8192x48xbf16>
    %cst = arith.constant dense<0.000000e+00> : vector<8x48xf32>
    %3 = tpu.matmul %1, %2, %cst {dimension_numbers = #tpu.dot_dimension_numbers<[1], [0], [0], [1], [0, 0, 1, 1], [], []>} : vector<8x8192xbf16>, vector<8192x48xbf16>, vector<8x48xf32> -> vector<8x48xf32>
    %c0_3 = arith.constant 0 : index
    %c0_4 = arith.constant 0 : index
    %4 = vector.load %arg3[%c0_3, %c0_4] : memref<1x48xf32, #tpu.memory_space<vmem>>, vector<1x48xf32>
    %5 = vector.broadcast %4 : vector<1x48xf32> to vector<8x48xf32>
    %6 = arith.addf %3, %5 : vector<8x48xf32>
    %c0_5 = arith.constant 0 : index
    %c0_6 = arith.constant 0 : index
    %7 = vector.load %arg4[%c0_5, %c0_6] : memref<8x48xf32, #tpu.memory_space<vmem>>, vector<8x48xf32>
    tpu.vector_store %arg4[%c0_5, %c0_6], %6 {strides = array<i32>} : memref<8x48xf32, #tpu.memory_space<vmem>>, vector<8x48xf32>,
    return
  }
  func.func @transform_0(%arg0: i32) -> (i32, i32) {
    %c0_i32 = arith.constant 0 : i32
    %c0_i32_0 = arith.constant 0 : i32
    return %arg0, %c0_i32 : i32, i32
  }
  func.func @transform_1(%arg0: i32) -> (i32, i32) {
    %c0_i32 = arith.constant 0 : i32
    %c0_i32_0 = arith.constant 0 : i32
    %c0_i32_1 = arith.constant 0 : i32
    return %c0_i32, %c0_i32_0 : i32, i32
  }
  func.func @transform_2(%arg0: i32) -> (i32, i32) {
    %c0_i32 = arith.constant 0 : i32
    %c0_i32_0 = arith.constant 0 : i32
    %c0_i32_1 = arith.constant 0 : i32
    return %c0_i32, %c0_i32_0 : i32, i32
  }
  func.func @transform_3(%arg0: i32) -> (i32, i32) {
    %c0_i32 = arith.constant 0 : i32
    %c0_i32_0 = arith.constant 0 : i32
    return %arg0, %c0_i32 : i32, i32
  }
}

</mosaic_0001>

<bundles_post_ra>
// kernel: tpu_custom_call.1
= control target key start
LH: loop header
LB: loop body
LE: loop exit
PB: predicated region body
PF: predicated region fallthrough
CT: control target
= control target key end

     0   :  { %s9466_s0 = inlined_call_operand.vmem [shape: f32[8,8192], index: 0, kind: input, shape index: {}]   ;;  %s9467_s1 = inlined_call_operand.vmem [shape: bf16[8192,48], index: 1, kind: input, shape index: {}]   ;;  %s9468_s2 = inlined_call_operand.vmem [shape: f32[1,48], index: 2, kind: input, shape index: {}]   ;;  %s9469_s3 = inlined_call_operand.hbm [shape: f32[8,48], index: 3, kind: output, shape index: {}]  }
   0x1   :  { %v7148_v0 = vld [vmem:[%s9467_s1 + $0x38] sm:$0xff]  ;;  %v7147_v4 = vld [vmem:[%s9467_s1 + $0x30] sm:$0xff]  ;;  %v7146_v8 = vld [vmem:[%s9467_s1 + $0x28] sm:$0xff] }
   0x2   :  { %v7156_v1 = vld [vmem:[%s9467_s1 + $0x78] sm:$0xff]  ;;  %4243 = vmatpush.bf16.msra.mxu0 %v7148_v0  ;;  %v7155_v5 = vld [vmem:[%s9467_s1 + $0x70] sm:$0xff]  ;;  %v7154_v9 = vld [vmem:[%s9467_s1 + $0x68] sm:$0xff] }
   0x3   :  { %v7164_v2 = vld [vmem:[%s9467_s1 + $0xb8] sm:$0xff]  ;;  %4256 = vmatpush.bf16.msra.mxu1 %v7156_v1  ;;  %v7163_v6 = vld [vmem:[%s9467_s1 + $0xb0] sm:$0xff]  ;;  %v7162_v10 = vld [vmem:[%s9467_s1 + $0xa8] sm:$0xff] }
   0x4   :  { %v7172_v3 = vld [vmem:[%s9467_s1 + $0xf8] sm:$0xff]  ;;  %4269 = vmatpush.bf16.msra.mxu2 %v7164_v2  ;;  %v7171_v7 = vld [vmem:[%s9467_s1 + $0xf0] sm:$0xff]  ;;  %v7170_v11 = vld [vmem:[%s9467_s1 + $0xe8] sm:$0xff] }
   0x5   :  { %4282 = vmatpush.bf16.msra.mxu3 %v7172_v3  ;;  %v7145_v12 = vld [vmem:[%s9467_s1 + $0x20] sm:$0xff]  ;;  %v7144_v16 = vld [vmem:[%s9467_s1 + $0x18] sm:$0xff]  ;;  %v7143_v20 = vld [vmem:[%s9467_s1 + $0x10] sm:$0xff] }
   0x6   :  { %4244 = vmatpush.bf16.msra.mxu0 %v7147_v4  ;;  %v7153_v13 = vld [vmem:[%s9467_s1 + $0x60] sm:$0xff]  ;;  %v7152_v17 = vld [vmem:[%s9467_s1 + $0x58] sm:$0xff]  ;;  %v7151_v21 = vld [vmem:[%s9467_s1 + $0x50] sm:$0xff] }
   0x7   :  { %4257 = vmatpush.bf16.msra.mxu1 %v7155_v5  ;;  %v7161_v14 = vld [vmem:[%s9467_s1 + $0xa0] sm:$0xff]  ;;  %v7160_v18 = vld [vmem:[%s9467_s1 + $0x98] sm:$0xff] }
   0x8   :  { %4270 = vmatpush.bf16.msra.mxu2 %v7163_v6  ;;  %v7169_v15 = vld [vmem:[%s9467_s1 + $0xe0] sm:$0xff]  ;;  %v7168_v19 = vld [vmem:[%s9467_s1 + $0xd8] sm:$0xff] }
   0x9   :  { %4283 = vmatpush.bf16.msra.mxu3 %v7171_v7 }
   0xa   :  { %4245 = vmatpush.bf16.msra.mxu0 %v7146_v8 }
   0xb   :  { %4258 = vmatpush.bf16.msra.mxu1 %v7154_v9 }
   0xc   :  { %4271 = vmatpush.bf16.msra.mxu2 %v7162_v10 }
   0xd   :  { %4284 = vmatpush.bf16.msra.mxu3 %v7170_v11 }
   0xe   :  { %4246 = vmatpush.bf16.msra.mxu0 %v7145_v12 }
   0xf   :  { %4259 = vmatpush.bf16.msra.mxu1 %v7153_v13 }
  0x10   :  { %4272 = vmatpush.bf16.msra.mxu2 %v7161_v14 }
  0x11   :  { %4285 = vmatpush.bf16.msra.mxu3 %v7169_v15 }
  0x12   :  { %4247 = vmatpush.bf16.msra.mxu0 %v7144_v16 }
  0x13   :  { %4260 = vmatpush.bf16.msra.mxu1 %v7152_v17 }
  0x14   :  { %8 = vsyncpa [#allocation3], 0  ;;  %4273 = vmatpush.bf16.msra.mxu2 %v7160_v18  ;;  %v7159_v22 = vld [vmem:[%s9467_s1 + $0x90] sm:$0xff]  ;;  %v7142_v24 = vld [vmem:[%s9467_s1 + $0x8] sm:$0xff]  ;;  %s5084_s6 = sshll.u32 %s9469_s3, 4  ;;  %vm5075_vm0 = vcmask 392192   ;;  %s5085_s6 = int_to_ptr.hbm [resolvable:$true] %s5084_s6 }
  0x15   :  { %4286 = vmatpush.bf16.msra.mxu3 %v7168_v19  ;;  %v7167_v23 = vld [vmem:[%s9467_s1 + $0xd0] sm:$0xff]  ;;  %v7150_v25 = vld [vmem:[%s9467_s1 + $0x48] sm:$0xff]  ;;  %v7141_v28 = vld [vmem:[%s9467_s1] sm:$0xff] }
  0x16   :  { %4248 = vmatpush.bf16.msra.mxu0 %v7143_v20  ;;  %v7158_v26 = vld [vmem:[%s9467_s1 + $0x88] sm:$0xff]  ;;  %v7149_v29 = vld [vmem:[%s9467_s1 + $0x40] sm:$0xff]  ;;  %v7180_v32 = vld [vmem:[%s9467_s1 + $0x138] sm:$0xff] }
  0x17   :  { %4261 = vmatpush.bf16.msra.mxu1 %v7151_v21  ;;  %v7166_v27 = vld [vmem:[%s9467_s1 + $0xc8] sm:$0xff]  ;;  %v7157_v30 = vld [vmem:[%s9467_s1 + $0x80] sm:$0xff]  ;;  %v17_v33 = vld [vmem:[%s9466_s0 + $0x10] sm:$0xff] }
  0x18   :  { %4274 = vmatpush.bf16.msra.mxu2 %v7159_v22  ;;  %v7165_v31 = vld [vmem:[%s9467_s1 + $0xc0] sm:$0xff]  ;;  %v7188_v35 = vld [vmem:[%s9467_s1 + $0x178] sm:$0xff]  ;;  %v16_v37 = vld [vmem:[%s9466_s0 + $0x8] sm:$0xff]  ;;  %v81_v40 = vpack.c.bf16 %v17_v33, %v17_v33 }
  0x19   :  { %4287 = vmatpush.bf16.msra.mxu3 %v7167_v23  ;;  %v15_v34 = vld [vmem:[%s9466_s0] sm:$0xff]  ;;  %v18_v36 = vld [vmem:[%s9466_s0 + $0x18] sm:$0xff]  ;;  %v80_v43 = vpack.c.bf16 %v16_v37, %v16_v37  ;;  %v7179_v44 = vld [vmem:[%s9467_s1 + $0x130] sm:$0xff] }
  0x1a   :  { %4249 = vmatpush.bf16.msra.mxu0 %v7142_v24  ;;  %v7196_v38 = vld [vmem:[%s9467_s1 + $0x1b8] sm:$0xff]  ;;  %v79_v41 = vpack.c.bf16 %v15_v34, %v15_v34  ;;  %v82_v42 = vpack.c.bf16 %v18_v36, %v18_v36  ;;  %v7187_v45 = vld [vmem:[%s9467_s1 + $0x170] sm:$0xff]  ;;  %v7178_v48 = vld [vmem:[%s9467_s1 + $0x128] sm:$0xff] }
  0x1b   :  { %4262 = vmatpush.bf16.msra.mxu1 %v7150_v25  ;;  %v7204_v39 = vld [vmem:[%s9467_s1 + $0x1f8] sm:$0xff]  ;;  %v7195_v46 = vld [vmem:[%s9467_s1 + $0x1b0] sm:$0xff]  ;;  %v7186_v49 = vld [vmem:[%s9467_s1 + $0x168] sm:$0xff] }
  0x1c   :  { %4275 = vmatpush.bf16.msra.mxu2 %v7158_v26  ;;  %v7203_v47 = vld [vmem:[%s9467_s1 + $0x1f0] sm:$0xff]  ;;  %v7194_v50 = vld [vmem:[%s9467_s1 + $0x1a8] sm:$0xff]  ;;  %v7177_v52 = vld [vmem:[%s9467_s1 + $0x120] sm:$0xff] }
  0x1d   :  { %4288 = vmatpush.bf16.msra.mxu3 %v7166_v27  ;;  %v7202_v51 = vld [vmem:[%s9467_s1 + $0x1e8] sm:$0xff]  ;;  %v7185_v53 = vld [vmem:[%s9467_s1 + $0x160] sm:$0xff]  ;;  %v7176_v56 = vld [vmem:[%s9467_s1 + $0x118] sm:$0xff] }
  0x1e   :  { %4250 = vmatpush.bf16.msra.mxu0 %v7141_v28  ;;  %v7193_v54 = vld [vmem:[%s9467_s1 + $0x1a0] sm:$0xff]  ;;  %v7184_v57 = vld [vmem:[%s9467_s1 + $0x158] sm:$0xff]  ;;  %v7175_v60 = vld [vmem:[%s9467_s1 + $0x110] sm:$0xff] }
  0x1f   :  { %4263 = vmatpush.bf16.msra.mxu1 %v7149_v29  ;;  %v7201_v55 = vld [vmem:[%s9467_s1 + $0x1e0] sm:$0xff]  ;;  %v7192_v58 = vld [vmem:[%s9467_s1 + $0x198] sm:$0xff]  ;;  %v7183_v61 = vld [vmem:[%s9467_s1 + $0x150] sm:$0xff] }
  0x20   :  { %4276 = vmatpush.bf16.msra.mxu2 %v7157_v30  ;;  %v7200_v59 = vld [vmem:[%s9467_s1 + $0x1d8] sm:$0xff]  ;;  %v7191_v62 = vld [vmem:[%s9467_s1 + $0x190] sm:$0xff]  ;;  %v7174_v0 = vld [vmem:[%s9467_s1 + $0x108] sm:$0xff] }
  0x21   :  { %4289 = vmatpush.bf16.msra.mxu3 %v7165_v31  ;;  %4251 = vmatmul.bf16.vlgmr.msra.gmra.mxu0 %v79_v41  ;;  %v7199_v63 = vld [vmem:[%s9467_s1 + $0x1d0] sm:$0xff]  ;;  %v7182_v1 = vld [vmem:[%s9467_s1 + $0x148] sm:$0xff]  ;;  %v7173_v4 = vld [vmem:[%s9467_s1 + $0x100] sm:$0xff] }
  0x22   :  { %4295 = vmatpush.bf16.msrb.mxu0 %v7180_v32  ;;  %4264 = vmatmul.bf16.vlgmr.msra.gmra.mxu1 %v80_v43  ;;  %v7190_v2 = vld [vmem:[%s9467_s1 + $0x188] sm:$0xff]  ;;  %v7181_v5 = vld [vmem:[%s9467_s1 + $0x140] sm:$0xff]  ;;  %v7212_v8 = vld [vmem:[%s9467_s1 + $0x238] sm:$0xff] }
  0x23   :  { %4308 = vmatpush.bf16.msrb.mxu1 %v7188_v35  ;;  %4277 = vmatmul.bf16.vlgmr.msra.gmra.mxu2 %v81_v40  ;;  %v7198_v3 = vld [vmem:[%s9467_s1 + $0x1c8] sm:$0xff]  ;;  %v7189_v6 = vld [vmem:[%s9467_s1 + $0x180] sm:$0xff]  ;;  %v21_v9 = vld [vmem:[%s9466_s0 + $0x30] sm:$0xff] }
  0x24   :  { %4321 = vmatpush.bf16.msrb.mxu2 %v7196_v38  ;;  %4290 = vmatmul.bf16.vlgmr.msra.gmra.mxu3 %v82_v42  ;;  %v7197_v7 = vld [vmem:[%s9467_s1 + $0x1c0] sm:$0xff]  ;;  %v7220_v11 = vld [vmem:[%s9467_s1 + $0x278] sm:$0xff]  ;;  %v20_v13 = vld [vmem:[%s9466_s0 + $0x28] sm:$0xff]  ;;  %v85_v16 = vpack.c.bf16 %v21_v9, %v21_v9 }
  0x25   :  { %4334 = vmatpush.bf16.msrb.mxu3 %v7204_v39  ;;  %v19_v10 = vld [vmem:[%s9466_s0 + $0x20] sm:$0xff]  ;;  %v22_v12 = vld [vmem:[%s9466_s0 + $0x38] sm:$0xff]  ;;  %v84_v19 = vpack.c.bf16 %v20_v13, %v20_v13  ;;  %v7211_v20 = vld [vmem:[%s9467_s1 + $0x230] sm:$0xff] }
  0x26   :  { %4296 = vmatpush.bf16.msrb.mxu0 %v7179_v44  ;;  %v7228_v14 = vld [vmem:[%s9467_s1 + $0x2b8] sm:$0xff]  ;;  %v83_v17 = vpack.c.bf16 %v19_v10, %v19_v10  ;;  %v86_v18 = vpack.c.bf16 %v22_v12, %v22_v12  ;;  %v7219_v21 = vld [vmem:[%s9467_s1 + $0x270] sm:$0xff]  ;;  %v7210_v24 = vld [vmem:[%s9467_s1 + $0x228] sm:$0xff] }
  0x27   :  { %4309 = vmatpush.bf16.msrb.mxu1 %v7187_v45  ;;  %v7236_v15 = vld [vmem:[%s9467_s1 + $0x2f8] sm:$0xff]  ;;  %v7227_v22 = vld [vmem:[%s9467_s1 + $0x2b0] sm:$0xff]  ;;  %v7218_v25 = vld [vmem:[%s9467_s1 + $0x268] sm:$0xff] }
  0x28   :  { %4322 = vmatpush.bf16.msrb.mxu2 %v7195_v46  ;;  %v7235_v23 = vld [vmem:[%s9467_s1 + $0x2f0] sm:$0xff]  ;;  %v7226_v26 = vld [vmem:[%s9467_s1 + $0x2a8] sm:$0xff]  ;;  %v7209_v28 = vld [vmem:[%s9467_s1 + $0x220] sm:$0xff] }
  0x29   :  { %4335 = vmatpush.bf16.msrb.mxu3 %v7203_v47  ;;  %v7234_v27 = vld [vmem:[%s9467_s1 + $0x2e8] sm:$0xff]  ;;  %v7217_v29 = vld [vmem:[%s9467_s1 + $0x260] sm:$0xff]  ;;  %v7208_v32 = vld [vmem:[%s9467_s1 + $0x218] sm:$0xff] }
  0x2a   :  { %4297 = vmatpush.bf16.msrb.mxu0 %v7178_v48  ;;  %v7225_v30 = vld [vmem:[%s9467_s1 + $0x2a0] sm:$0xff]  ;;  %v7216_v33 = vld [vmem:[%s9467_s1 + $0x258] sm:$0xff]  ;;  %v7207_v36 = vld [vmem:[%s9467_s1 + $0x210] sm:$0xff] }
  0x2b   :  { %4310 = vmatpush.bf16.msrb.mxu1 %v7186_v49  ;;  %v7233_v31 = vld [vmem:[%s9467_s1 + $0x2e0] sm:$0xff]  ;;  %v7224_v34 = vld [vmem:[%s9467_s1 + $0x298] sm:$0xff]  ;;  %v7215_v37 = vld [vmem:[%s9467_s1 + $0x250] sm:$0xff] }
  0x2c   :  { %4323 = vmatpush.bf16.msrb.mxu2 %v7194_v50  ;;  %v7232_v35 = vld [vmem:[%s9467_s1 + $0x2d8] sm:$0xff]  ;;  %v7223_v38 = vld [vmem:[%s9467_s1 + $0x290] sm:$0xff]  ;;  %v7206_v40 = vld [vmem:[%s9467_s1 + $0x208] sm:$0xff] }
  0x2d   :  { %4336 = vmatpush.bf16.msrb.mxu3 %v7202_v51  ;;  %v7231_v39 = vld [vmem:[%s9467_s1 + $0x2d0] sm:$0xff]  ;;  %v7214_v41 = vld [vmem:[%s9467_s1 + $0x248] sm:$0xff]  ;;  %v7205_v44 = vld [vmem:[%s9467_s1 + $0x200] sm:$0xff] }
  0x2e   :  { %4298 = vmatpush.bf16.msrb.mxu0 %v7177_v52  ;;  %v7222_v42 = vld [vmem:[%s9467_s1 + $0x288] sm:$0xff]  ;;  %v7213_v45 = vld [vmem:[%s9467_s1 + $0x240] sm:$0xff]  ;;  %v7244_v48 = vld [vmem:[%s9467_s1 + $0x338] sm:$0xff] }
  0x2f   :  { %4311 = vmatpush.bf16.msrb.mxu1 %v7185_v53  ;;  %v7230_v43 = vld [vmem:[%s9467_s1 + $0x2c8] sm:$0xff]  ;;  %v7221_v46 = vld [vmem:[%s9467_s1 + $0x280] sm:$0xff]  ;;  %v25_v50 = vld [vmem:[%s9466_s0 + $0x50] sm:$0xff] }
  0x30   :  { %4324 = vmatpush.bf16.msrb.mxu2 %v7193_v54  ;;  %v7229_v47 = vld [vmem:[%s9467_s1 + $0x2c0] sm:$0xff]  ;;  %v7252_v51 = vld [vmem:[%s9467_s1 + $0x378] sm:$0xff]  ;;  %v24_v52 = vld [vmem:[%s9466_s0 + $0x48] sm:$0xff] }
  0x31   :  { %4337 = vmatpush.bf16.msrb.mxu3 %v7201_v55  ;;  %v23_v49 = vld [vmem:[%s9466_s0 + $0x40] sm:$0xff]  ;;  %v26_v53 = vld [vmem:[%s9466_s0 + $0x58] sm:$0xff]  ;;  %v7239_v12 = vld [vmem:[%s9467_s1 + $0x310] sm:$0xff] }
  0x32   :  { %4299 = vmatpush.bf16.msrb.mxu0 %v7176_v56  ;;  %v7260_v54 = vld [vmem:[%s9467_s1 + $0x3b8] sm:$0xff]  ;;  %v87_v56 = vpack.c.bf16 %v23_v49, %v23_v49  ;;  %v7247_v13 = vld [vmem:[%s9467_s1 + $0x350] sm:$0xff] }
  0x33   :  { %4312 = vmatpush.bf16.msrb.mxu1 %v7184_v57  ;;  %v7268_v55 = vld [vmem:[%s9467_s1 + $0x3f8] sm:$0xff]  ;;  %v89_v57 = vpack.c.bf16 %v25_v50, %v25_v50 }
  0x34   :  { %4325 = vmatpush.bf16.msrb.mxu2 %v7192_v58  ;;  %v88_v58 = vpack.c.bf16 %v24_v52, %v24_v52  ;;  %v7248_v9 = vld [vmem:[%s9467_s1 + $0x358] sm:$0xff]  ;;  %v7271_v52 = vld [vmem:[%s9467_s1 + $0x410] sm:$0xff] }
  0x35   :  { %4338 = vmatpush.bf16.msrb.mxu3 %v7200_v59  ;;  %v90_v59 = vpack.c.bf16 %v26_v53, %v26_v53  ;;  %v7256_v10 = vld [vmem:[%s9467_s1 + $0x398] sm:$0xff]  ;;  %v7279_v53 = vld [vmem:[%s9467_s1 + $0x450] sm:$0xff] }
  0x36   :  { %4300 = vmatpush.bf16.msrb.mxu0 %v7175_v60  ;;  %v7243_v60 = vld [vmem:[%s9467_s1 + $0x330] sm:$0xff]  ;;  %v7280_v49 = vld [vmem:[%s9467_s1 + $0x458] sm:$0xff] }
  0x37   :  { %4313 = vmatpush.bf16.msrb.mxu1 %v7183_v61  ;;  %v7251_v61 = vld [vmem:[%s9467_s1 + $0x370] sm:$0xff]  ;;  %v7288_v50 = vld [vmem:[%s9467_s1 + $0x498] sm:$0xff] }
  0x38   :  { %4326 = vmatpush.bf16.msrb.mxu2 %v7191_v62  ;;  %v7259_v62 = vld [vmem:[%s9467_s1 + $0x3b0] sm:$0xff] }
  0x39   :  { %4339 = vmatpush.bf16.msrb.mxu3 %v7199_v63  ;;  %v7267_v63 = vld [vmem:[%s9467_s1 + $0x3f0] sm:$0xff] }
  0x3a   :  { %4301 = vmatpush.bf16.msrb.mxu0 %v7174_v0  ;;  %v7242_v0 = vld [vmem:[%s9467_s1 + $0x328] sm:$0xff] }
  0x3b   :  { %4314 = vmatpush.bf16.msrb.mxu1 %v7182_v1  ;;  %v7250_v1 = vld [vmem:[%s9467_s1 + $0x368] sm:$0xff] }
  0x3c   :  { %4327 = vmatpush.bf16.msrb.mxu2 %v7190_v2  ;;  %v7258_v2 = vld [vmem:[%s9467_s1 + $0x3a8] sm:$0xff] }
  0x3d   :  { %4340 = vmatpush.bf16.msrb.mxu3 %v7198_v3  ;;  %v7266_v3 = vld [vmem:[%s9467_s1 + $0x3e8] sm:$0xff] }
  0x3e   :  { %4302 = vmatpush.bf16.msrb.mxu0 %v7173_v4  ;;  %v7241_v4 = vld [vmem:[%s9467_s1 + $0x320] sm:$0xff] }
  0x3f   :  { %4315 = vmatpush.bf16.msrb.mxu1 %v7181_v5  ;;  %v7249_v5 = vld [vmem:[%s9467_s1 + $0x360] sm:$0xff] }
  0x40   :  { %4328 = vmatpush.bf16.msrb.mxu2 %v7189_v6  ;;  %v7257_v6 = vld [vmem:[%s9467_s1 + $0x3a0] sm:$0xff] }
  0x41   :  { %4341 = vmatpush.bf16.msrb.mxu3 %v7197_v7  ;;  %4303 = vmatmul.bf16.vlgmr.msrb.gmra.mxu0 %v83_v17  ;;  %v7265_v7 = vld [vmem:[%s9467_s1 + $0x3e0] sm:$0xff]  ;;  %v7246_v17 = vld [vmem:[%s9467_s1 + $0x348] sm:$0xff] }
  0x42   :  { %4347 = vmatpush.bf16.msra.mxu0 %v7212_v8  ;;  %4316 = vmatmul.bf16.vlgmr.msrb.gmra.mxu1 %v84_v19  ;;  %v7240_v8 = vld [vmem:[%s9467_s1 + $0x318] sm:$0xff]  ;;  %v7262_v19 = vld [vmem:[%s9467_s1 + $0x3c8] sm:$0xff] }
  0x43   :  { %4360 = vmatpush.bf16.msra.mxu1 %v7220_v11  ;;  %4329 = vmatmul.bf16.vlgmr.msrb.gmra.mxu2 %v85_v16  ;;  %v7264_v11 = vld [vmem:[%s9467_s1 + $0x3d8] sm:$0xff]  ;;  %v7238_v16 = vld [vmem:[%s9467_s1 + $0x308] sm:$0xff] }
  0x44   :  { %4373 = vmatpush.bf16.msra.mxu2 %v7228_v14  ;;  %4342 = vmatmul.bf16.vlgmr.msrb.gmra.mxu3 %v86_v18  ;;  %v7255_v14 = vld [vmem:[%s9467_s1 + $0x390] sm:$0xff]  ;;  %v7254_v18 = vld [vmem:[%s9467_s1 + $0x388] sm:$0xff] }
  0x45   :  { %4386 = vmatpush.bf16.msra.mxu3 %v7236_v15  ;;  %v7263_v15 = vld [vmem:[%s9467_s1 + $0x3d0] sm:$0xff] }
  0x46   :  { %4348 = vmatpush.bf16.msra.mxu0 %v7211_v20  ;;  %v7237_v20 = vld [vmem:[%s9467_s1 + $0x300] sm:$0xff] }
  0x47   :  { %4361 = vmatpush.bf16.msra.mxu1 %v7219_v21  ;;  %v7245_v21 = vld [vmem:[%s9467_s1 + $0x340] sm:$0xff] }
  0x48   :  { %4374 = vmatpush.bf16.msra.mxu2 %v7227_v22  ;;  %v7253_v22 = vld [vmem:[%s9467_s1 + $0x380] sm:$0xff] }
  0x49   :  { %4387 = vmatpush.bf16.msra.mxu3 %v7235_v23  ;;  %v7261_v23 = vld [vmem:[%s9467_s1 + $0x3c0] sm:$0xff] }
  0x4a   :  { %4349 = vmatpush.bf16.msra.mxu0 %v7210_v24  ;;  %v7276_v24 = vld [vmem:[%s9467_s1 + $0x438] sm:$0xff] }
  0x4b   :  { %4362 = vmatpush.bf16.msra.mxu1 %v7218_v25  ;;  %v27_v25 = vld [vmem:[%s9466_s0 + $0x60] sm:$0xff] }
  0x4c   :  { %4375 = vmatpush.bf16.msra.mxu2 %v7226_v26  ;;  %v29_v26 = vld [vmem:[%s9466_s0 + $0x70] sm:$0xff] }
  0x4d   :  { %4388 = vmatpush.bf16.msra.mxu3 %v7234_v27  ;;  %v7284_v27 = vld [vmem:[%s9467_s1 + $0x478] sm:$0xff] }
  0x4e   :  { %4350 = vmatpush.bf16.msra.mxu0 %v7209_v28  ;;  %v28_v28 = vld [vmem:[%s9466_s0 + $0x68] sm:$0xff] }
  0x4f   :  { %4363 = vmatpush.bf16.msra.mxu1 %v7217_v29  ;;  %v30_v29 = vld [vmem:[%s9466_s0 + $0x78] sm:$0xff] }
  0x50   :  { %4376 = vmatpush.bf16.msra.mxu2 %v7225_v30  ;;  %v7292_v30 = vld [vmem:[%s9467_s1 + $0x4b8] sm:$0xff] }
  0x51   :  { %4389 = vmatpush.bf16.msra.mxu3 %v7233_v31  ;;  %v7300_v31 = vld [vmem:[%s9467_s1 + $0x4f8] sm:$0xff] }
  0x52   :  { %4351 = vmatpush.bf16.msra.mxu0 %v7208_v32  ;;  %v91_v32 = vpack.c.bf16 %v27_v25, %v27_v25 }
  0x53   :  { %4364 = vmatpush.bf16.msra.mxu1 %v7216_v33  ;;  %v93_v33 = vpack.c.bf16 %v29_v26, %v29_v26  ;;  %v7321_v26 = vld [vmem:[%s9467_s1 + $0x5a0] sm:$0xff] }
  0x54   :  { %4377 = vmatpush.bf16.msra.mxu2 %v7224_v34  ;;  %v92_v34 = vpack.c.bf16 %v28_v28, %v28_v28 }
  0x55   :  { %4390 = vmatpush.bf16.msra.mxu3 %v7232_v35  ;;  %v94_v35 = vpack.c.bf16 %v30_v29, %v30_v29  ;;  %v7304_v29 = vld [vmem:[%s9467_s1 + $0x518] sm:$0xff] }
  0x56   :  { %4352 = vmatpush.bf16.msra.mxu0 %v7207_v36  ;;  %v7275_v36 = vld [vmem:[%s9467_s1 + $0x430] sm:$0xff] }
  0x57   :  { %4365 = vmatpush.bf16.msra.mxu1 %v7215_v37  ;;  %v7283_v37 = vld [vmem:[%s9467_s1 + $0x470] sm:$0xff] }
  0x58   :  { %4378 = vmatpush.bf16.msra.mxu2 %v7223_v38  ;;  %v7291_v38 = vld [vmem:[%s9467_s1 + $0x4b0] sm:$0xff] }
  0x59   :  { %4391 = vmatpush.bf16.msra.mxu3 %v7231_v39  ;;  %v7299_v39 = vld [vmem:[%s9467_s1 + $0x4f0] sm:$0xff] }
  0x5a   :  { %4353 = vmatpush.bf16.msra.mxu0 %v7206_v40  ;;  %v7274_v40 = vld [vmem:[%s9467_s1 + $0x428] sm:$0xff] }
  0x5b   :  { %4366 = vmatpush.bf16.msra.mxu1 %v7214_v41  ;;  %v7282_v41 = vld [vmem:[%s9467_s1 + $0x468] sm:$0xff] }
  0x5c   :  { %4379 = vmatpush.bf16.msra.mxu2 %v7222_v42  ;;  %v7290_v42 = vld [vmem:[%s9467_s1 + $0x4a8] sm:$0xff] }
  0x5d   :  { %4392 = vmatpush.bf16.msra.mxu3 %v7230_v43  ;;  %v7298_v43 = vld [vmem:[%s9467_s1 + $0x4e8] sm:$0xff] }
  0x5e   :  { %4354 = vmatpush.bf16.msra.mxu0 %v7205_v44  ;;  %v7273_v44 = vld [vmem:[%s9467_s1 + $0x420] sm:$0xff] }
  0x5f   :  { %4367 = vmatpush.bf16.msra.mxu1 %v7213_v45  ;;  %v7281_v45 = vld [vmem:[%s9467_s1 + $0x460] sm:$0xff] }
  0x60   :  { %4380 = vmatpush.bf16.msra.mxu2 %v7221_v46  ;;  %v7289_v46 = vld [vmem:[%s9467_s1 + $0x4a0] sm:$0xff] }
  0x61   :  { %4393 = vmatpush.bf16.msra.mxu3 %v7229_v47  ;;  %4355 = vmatmul.bf16.vlgmr.msra.gmra.mxu0 %v87_v56  ;;  %v7297_v47 = vld [vmem:[%s9467_s1 + $0x4e0] sm:$0xff]  ;;  %v7270_v56 = vld [vmem:[%s9467_s1 + $0x408] sm:$0xff] }
  0x62   :  { %4399 = vmatpush.bf16.msrb.mxu0 %v7244_v48  ;;  %4368 = vmatmul.bf16.vlgmr.msra.gmra.mxu1 %v88_v58  ;;  %v7272_v48 = vld [vmem:[%s9467_s1 + $0x418] sm:$0xff]  ;;  %v7286_v58 = vld [vmem:[%s9467_s1 + $0x488] sm:$0xff] }
  0x63   :  { %4412 = vmatpush.bf16.msrb.mxu1 %v7252_v51  ;;  %4381 = vmatmul.bf16.vlgmr.msra.gmra.mxu2 %v89_v57  ;;  %v7296_v51 = vld [vmem:[%s9467_s1 + $0x4d8] sm:$0xff]  ;;  %v7278_v57 = vld [vmem:[%s9467_s1 + $0x448] sm:$0xff] }
  0x64   :  { %4425 = vmatpush.bf16.msrb.mxu2 %v7260_v54  ;;  %4394 = vmatmul.bf16.vlgmr.msra.gmra.mxu3 %v90_v59  ;;  %v7287_v54 = vld [vmem:[%s9467_s1 + $0x490] sm:$0xff]  ;;  %v7294_v59 = vld [vmem:[%s9467_s1 + $0x4c8] sm:$0xff] }
  0x65   :  { %4438 = vmatpush.bf16.msrb.mxu3 %v7268_v55  ;;  %v7295_v55 = vld [vmem:[%s9467_s1 + $0x4d0] sm:$0xff] }
  0x66   :  { %4400 = vmatpush.bf16.msrb.mxu0 %v7243_v60  ;;  %v7269_v60 = vld [vmem:[%s9467_s1 + $0x400] sm:$0xff] }
  0x67   :  { %4413 = vmatpush.bf16.msrb.mxu1 %v7251_v61  ;;  %v7277_v61 = vld [vmem:[%s9467_s1 + $0x440] sm:$0xff] }
  0x68   :  { %4426 = vmatpush.bf16.msrb.mxu2 %v7259_v62  ;;  %v7285_v62 = vld [vmem:[%s9467_s1 + $0x480] sm:$0xff] }
  0x69   :  { %4439 = vmatpush.bf16.msrb.mxu3 %v7267_v63  ;;  %v7293_v63 = vld [vmem:[%s9467_s1 + $0x4c0] sm:$0xff] }
  0x6a   :  { %4401 = vmatpush.bf16.msrb.mxu0 %v7242_v0  ;;  %v7308_v0 = vld [vmem:[%s9467_s1 + $0x538] sm:$0xff] }
  0x6b   :  { %4414 = vmatpush.bf16.msrb.mxu1 %v7250_v1  ;;  %v31_v1 = vld [vmem:[%s9466_s0 + $0x80] sm:$0xff] }
  0x6c   :  { %4427 = vmatpush.bf16.msrb.mxu2 %v7258_v2  ;;  %v33_v2 = vld [vmem:[%s9466_s0 + $0x90] sm:$0xff] }
  0x6d   :  { %4440 = vmatpush.bf16.msrb.mxu3 %v7266_v3  ;;  %v7316_v3 = vld [vmem:[%s9467_s1 + $0x578] sm:$0xff] }
  0x6e   :  { %4402 = vmatpush.bf16.msrb.mxu0 %v7241_v4  ;;  %v32_v4 = vld [vmem:[%s9466_s0 + $0x88] sm:$0xff] }
  0x6f   :  { %4415 = vmatpush.bf16.msrb.mxu1 %v7249_v5  ;;  %v34_v5 = vld [vmem:[%s9466_s0 + $0x98] sm:$0xff] }
  0x70   :  { %4428 = vmatpush.bf16.msrb.mxu2 %v7257_v6  ;;  %v7324_v6 = vld [vmem:[%s9467_s1 + $0x5b8] sm:$0xff] }
  0x71   :  { %4441 = vmatpush.bf16.msrb.mxu3 %v7265_v7  ;;  %v7332_v7 = vld [vmem:[%s9467_s1 + $0x5f8] sm:$0xff] }
  0x72   :  { %4403 = vmatpush.bf16.msrb.mxu0 %v7240_v8  ;;  %v95_v8 = vpack.c.bf16 %v31_v1, %v31_v1  ;;  %v7339_v1 = vld [vmem:[%s9467_s1 + $0x630] sm:$0xff] }
  0x73   :  { %4416 = vmatpush.bf16.msrb.mxu1 %v7248_v9  ;;  %v97_v9 = vpack.c.bf16 %v33_v2, %v33_v2  ;;  %v7347_v2 = vld [vmem:[%s9467_s1 + $0x670] sm:$0xff] }
  0x74   :  { %4429 = vmatpush.bf16.msrb.mxu2 %v7256_v10  ;;  %v96_v10 = vpack.c.bf16 %v32_v4, %v32_v4  ;;  %v7363_v4 = vld [vmem:[%s9467_s1 + $0x6f0] sm:$0xff] }
  0x75   :  { %4442 = vmatpush.bf16.msrb.mxu3 %v7264_v11  ;;  %v98_v11 = vpack.c.bf16 %v34_v5, %v34_v5  ;;  %v7338_v5 = vld [vmem:[%s9467_s1 + $0x628] sm:$0xff] }
  0x76   :  { %4404 = vmatpush.bf16.msrb.mxu0 %v7239_v12  ;;  %v7307_v12 = vld [vmem:[%s9467_s1 + $0x530] sm:$0xff] }
  0x77   :  { %4417 = vmatpush.bf16.msrb.mxu1 %v7247_v13  ;;  %v7315_v13 = vld [vmem:[%s9467_s1 + $0x570] sm:$0xff] }
  0x78   :  { %4430 = vmatpush.bf16.msrb.mxu2 %v7255_v14  ;;  %v7323_v14 = vld [vmem:[%s9467_s1 + $0x5b0] sm:$0xff] }
  0x79   :  { %4443 = vmatpush.bf16.msrb.mxu3 %v7263_v15  ;;  %v7331_v15 = vld [vmem:[%s9467_s1 + $0x5f0] sm:$0xff] }
  0x7a   :  { %4405 = vmatpush.bf16.msrb.mxu0 %v7238_v16  ;;  %v7306_v16 = vld [vmem:[%s9467_s1 + $0x528] sm:$0xff] }
  0x7b   :  { %4418 = vmatpush.bf16.msrb.mxu1 %v7246_v17  ;;  %v7314_v17 = vld [vmem:[%s9467_s1 + $0x568] sm:$0xff] }
  0x7c   :  { %4431 = vmatpush.bf16.msrb.mxu2 %v7254_v18  ;;  %v7654_v18 = vld [vmem:[%s9468_s2] ss:$0 sm:$0xff] }
  0x7d   :  { %4444 = vmatpush.bf16.msrb.mxu3 %v7262_v19  ;;  %v7322_v19 = vld [vmem:[%s9467_s1 + $0x5a8] sm:$0xff] }
  0x7e   :  { %4406 = vmatpush.bf16.msrb.mxu0 %v7237_v20  ;;  %v7330_v20 = vld [vmem:[%s9467_s1 + $0x5e8] sm:$0xff] }
  0x7f   :  { %4419 = vmatpush.bf16.msrb.mxu1 %v7245_v21 }
  0x80   :  { %4432 = vmatpush.bf16.msrb.mxu2 %v7253_v22  ;;  %v7305_v22 = vld [vmem:[%s9467_s1 + $0x520] sm:$0xff] }
  0x81   :  { %4445 = vmatpush.bf16.msrb.mxu3 %v7261_v23  ;;  %4407 = vmatmul.bf16.vlgmr.msrb.gmra.mxu0 %v91_v32  ;;  %v7313_v23 = vld [vmem:[%s9467_s1 + $0x560] sm:$0xff]  ;;  %v7328_v32 = vld [vmem:[%s9467_s1 + $0x5d8] sm:$0xff] }
  0x82   :  { %4451 = vmatpush.bf16.msra.mxu0 %v7276_v24  ;;  %4420 = vmatmul.bf16.vlgmr.msrb.gmra.mxu1 %v92_v34 }
  0x83   :  { %4464 = vmatpush.bf16.msra.mxu1 %v7284_v27  ;;  %4433 = vmatmul.bf16.vlgmr.msrb.gmra.mxu2 %v93_v33  ;;  %v7329_v27 = vld [vmem:[%s9467_s1 + $0x5e0] sm:$0xff] }
  0x84   :  { %4477 = vmatpush.bf16.msra.mxu2 %v7292_v30  ;;  %4446 = vmatmul.bf16.vlgmr.msrb.gmra.mxu3 %v94_v35  ;;  %v7312_v30 = vld [vmem:[%s9467_s1 + $0x558] sm:$0xff] }
  0x85   :  { %4490 = vmatpush.bf16.msra.mxu3 %v7300_v31  ;;  %v7320_v31 = vld [vmem:[%s9467_s1 + $0x598] sm:$0xff] }
  0x86   :  { %4452 = vmatpush.bf16.msra.mxu0 %v7275_v36 }
  0x87   :  { %4465 = vmatpush.bf16.msra.mxu1 %v7283_v37  ;;  %v7303_v37 = vld [vmem:[%s9467_s1 + $0x510] sm:$0xff] }
  0x88   :  { %4478 = vmatpush.bf16.msra.mxu2 %v7291_v38  ;;  %v7311_v38 = vld [vmem:[%s9467_s1 + $0x550] sm:$0xff] }
  0x89   :  { %4491 = vmatpush.bf16.msra.mxu3 %v7299_v39 }
  0x8a   :  { %4453 = vmatpush.bf16.msra.mxu0 %v7274_v40 }
  0x8b   :  { %4466 = vmatpush.bf16.msra.mxu1 %v7282_v41  ;;  %v7319_v41 = vld [vmem:[%s9467_s1 + $0x590] sm:$0xff] }
  0x8c   :  { %4479 = vmatpush.bf16.msra.mxu2 %v7290_v42  ;;  %v7327_v42 = vld [vmem:[%s9467_s1 + $0x5d0] sm:$0xff] }
  0x8d   :  { %4492 = vmatpush.bf16.msra.mxu3 %v7298_v43  ;;  %v7302_v43 = vld [vmem:[%s9467_s1 + $0x508] sm:$0xff] }
  0x8e   :  { %4454 = vmatpush.bf16.msra.mxu0 %v7273_v44  ;;  %v7310_v44 = vld [vmem:[%s9467_s1 + $0x548] sm:$0xff] }
  0x8f   :  { %4467 = vmatpush.bf16.msra.mxu1 %v7281_v45  ;;  %v7318_v45 = vld [vmem:[%s9467_s1 + $0x588] sm:$0xff] }
  0x90   :  { %4480 = vmatpush.bf16.msra.mxu2 %v7289_v46  ;;  %v7326_v46 = vld [vmem:[%s9467_s1 + $0x5c8] sm:$0xff] }
  0x91   :  { %4493 = vmatpush.bf16.msra.mxu3 %v7297_v47 }
  0x92   :  { %4455 = vmatpush.bf16.msra.mxu0 %v7272_v48 }
  0x93   :  { %4468 = vmatpush.bf16.msra.mxu1 %v7280_v49  ;;  %v7301_v49 = vld [vmem:[%s9467_s1 + $0x500] sm:$0xff] }
  0x94   :  { %4481 = vmatpush.bf16.msra.mxu2 %v7288_v50  ;;  %v7309_v50 = vld [vmem:[%s9467_s1 + $0x540] sm:$0xff] }
  0x95   :  { %4494 = vmatpush.bf16.msra.mxu3 %v7296_v51  ;;  %v7317_v51 = vld [vmem:[%s9467_s1 + $0x580] sm:$0xff] }
  0x96   :  { %4456 = vmatpush.bf16.msra.mxu0 %v7271_v52  ;;  %v7325_v52 = vld [vmem:[%s9467_s1 + $0x5c0] sm:$0xff] }
  0x97   :  { %4469 = vmatpush.bf16.msra.mxu1 %v7279_v53  ;;  %v7340_v53 = vld [vmem:[%s9467_s1 + $0x638] sm:$0xff] }
  0x98   :  { %4482 = vmatpush.bf16.msra.mxu2 %v7287_v54  ;;  %v35_v54 = vld [vmem:[%s9466_s0 + $0xa0] sm:$0xff] }
  0x99   :  { %4495 = vmatpush.bf16.msra.mxu3 %v7295_v55  ;;  %v37_v55 = vld [vmem:[%s9466_s0 + $0xb0] sm:$0xff] }
  0x9a   :  { %4457 = vmatpush.bf16.msra.mxu0 %v7270_v56  ;;  %v7348_v56 = vld [vmem:[%s9467_s1 + $0x678] sm:$0xff] }
  0x9b   :  { %4470 = vmatpush.bf16.msra.mxu1 %v7278_v57  ;;  %v36_v57 = vld [vmem:[%s9466_s0 + $0xa8] sm:$0xff] }
  0x9c   :  { %4483 = vmatpush.bf16.msra.mxu2 %v7286_v58  ;;  %v38_v58 = vld [vmem:[%s9466_s0 + $0xb8] sm:$0xff] }
  0x9d   :  { %4496 = vmatpush.bf16.msra.mxu3 %v7294_v59  ;;  %v7356_v59 = vld [vmem:[%s9467_s1 + $0x6b8] sm:$0xff] }
  0x9e   :  { %4458 = vmatpush.bf16.msra.mxu0 %v7269_v60  ;;  %v4252_v21 = vpop.f32.mrf.mxu0  ;;  %v7364_v60 = vld [vmem:[%s9467_s1 + $0x6f8] sm:$0xff] }
  0x9f   :  { %4471 = vmatpush.bf16.msra.mxu1 %v7277_v61  ;;  %v4253_v24 = vadd.f32 %v7654_v18, %v4252_v21  ;;  %v4265_v25 = vpop.f32.mrf.mxu1  ;;  %v99_v61 = vpack.c.bf16 %v35_v54, %v35_v54  ;;  %v7344_v18 = vld [vmem:[%s9467_s1 + $0x658] sm:$0xff]  ;;  %v7379_v54 = vld [vmem:[%s9467_s1 + $0x770] sm:$0xff] }
  0xa0   :  { %4484 = vmatpush.bf16.msra.mxu2 %v7285_v62  ;;  %v101_v62 = vpack.c.bf16 %v37_v55, %v37_v55  ;;  %v7387_v55 = vld [vmem:[%s9467_s1 + $0x7b0] sm:$0xff] }
  0xa1   :  { %4497 = vmatpush.bf16.msra.mxu3 %v7293_v63  ;;  %4459 = vmatmul.bf16.vlgmr.msra.gmra.mxu0 %v95_v8  ;;  %v4266_v28 = vadd.f32 %v4265_v25, %v4253_v24  ;;  %v100_v63 = vpack.c.bf16 %v36_v57, %v36_v57  ;;  %v7362_v8 = vld [vmem:[%s9467_s1 + $0x6e8] sm:$0xff]  ;;  %v7335_v25 = vld [vmem:[%s9467_s1 + $0x610] sm:$0xff] }
  0xa2   :  { %4503 = vmatpush.bf16.msrb.mxu0 %v7308_v0  ;;  %4472 = vmatmul.bf16.vlgmr.msra.gmra.mxu1 %v96_v10  ;;  %v102_v0 = vpack.c.bf16 %v38_v58, %v38_v58  ;;  %v7337_v10 = vld [vmem:[%s9467_s1 + $0x620] sm:$0xff]  ;;  %v7370_v57 = vld [vmem:[%s9467_s1 + $0x728] sm:$0xff] }
  0xa3   :  { %4516 = vmatpush.bf16.msrb.mxu1 %v7316_v3  ;;  %4485 = vmatmul.bf16.vlgmr.msra.gmra.mxu2 %v97_v9  ;;  %v7355_v3 = vld [vmem:[%s9467_s1 + $0x6b0] sm:$0xff]  ;;  %v7378_v58 = vld [vmem:[%s9467_s1 + $0x768] sm:$0xff] }
  0xa4   :  { %4529 = vmatpush.bf16.msrb.mxu2 %v7324_v6  ;;  %4498 = vmatmul.bf16.vlgmr.msra.gmra.mxu3 %v98_v11  ;;  %v7346_v6 = vld [vmem:[%s9467_s1 + $0x668] sm:$0xff]  ;;  %v7345_v11 = vld [vmem:[%s9467_s1 + $0x660] sm:$0xff] }
  0xa5   :  { %4542 = vmatpush.bf16.msrb.mxu3 %v7332_v7  ;;  %v7354_v7 = vld [vmem:[%s9467_s1 + $0x6a8] sm:$0xff] }
  0xa6   :  { %4504 = vmatpush.bf16.msrb.mxu0 %v7307_v12  ;;  %v4278_v33 = vpop.f32.mrf.mxu2  ;;  %v4254_v36 = vpop.f32.mrf.mxu0 }
  0xa7   :  { %4517 = vmatpush.bf16.msrb.mxu1 %v7315_v13  ;;  %v4279_v34 = vadd.f32 %v4278_v33, %v4266_v28  ;;  %v4291_v35 = vpop.f32.mrf.mxu3  ;;  %v4267_v40 = vpop.f32.mrf.mxu1  ;;  %v7350_v33 = vld [vmem:[%s9467_s1 + $0x688] sm:$0xff] }
  0xa8   :  { %4530 = vmatpush.bf16.msrb.mxu2 %v7323_v14  ;;  %v7353_v14 = vld [vmem:[%s9467_s1 + $0x6a0] sm:$0xff] }
  0xa9   :  { %4543 = vmatpush.bf16.msrb.mxu3 %v7331_v15  ;;  %v8311_v39 = vadd.f32 %v4291_v35, %v4279_v34  ;;  %v7361_v15 = vld [vmem:[%s9467_s1 + $0x6e0] sm:$0xff]  ;;  %v7358_v34 = vld [vmem:[%s9467_s1 + $0x6c8] sm:$0xff] }
  0xaa   :  { %4505 = vmatpush.bf16.msrb.mxu0 %v7306_v16  ;;  %v7357_v40 = vld [vmem:[%s9467_s1 + $0x6c0] sm:$0xff] }
  0xab   :  { %4518 = vmatpush.bf16.msrb.mxu1 %v7314_v17  ;;  %v7336_v17 = vld [vmem:[%s9467_s1 + $0x618] sm:$0xff] }
  0xac   :  { %4531 = vmatpush.bf16.msrb.mxu2 %v7322_v19  ;;  %v7352_v19 = vld [vmem:[%s9467_s1 + $0x698] sm:$0xff] }
  0xad   :  { %4544 = vmatpush.bf16.msrb.mxu3 %v7330_v20  ;;  %v7360_v20 = vld [vmem:[%s9467_s1 + $0x6d8] sm:$0xff] }
  0xae   :  { %4506 = vmatpush.bf16.msrb.mxu0 %v7305_v22  ;;  %v4280_v47 = vpop.f32.mrf.mxu2 }
  0xaf   :  { %4519 = vmatpush.bf16.msrb.mxu1 %v7313_v23  ;;  %v4293_v48 = vpop.f32.mrf.mxu3  ;;  %v7388_v47 = vld [vmem:[%s9467_s1 + $0x7b8] sm:$0xff] }
  0xb0   :  { %4532 = vmatpush.bf16.msrb.mxu2 %v7321_v26  ;;  %v7343_v26 = vld [vmem:[%s9467_s1 + $0x650] sm:$0xff]  ;;  %v7396_v48 = vld [vmem:[%s9467_s1 + $0x7f8] sm:$0xff] }
  0xb1   :  { %4545 = vmatpush.bf16.msrb.mxu3 %v7329_v27 }
  0xb2   :  { %4507 = vmatpush.bf16.msrb.mxu0 %v7304_v29  ;;  %v7351_v29 = vld [vmem:[%s9467_s1 + $0x690] sm:$0xff] }
  0xb3   :  { %4520 = vmatpush.bf16.msrb.mxu1 %v7312_v30  ;;  %v7359_v30 = vld [vmem:[%s9467_s1 + $0x6d0] sm:$0xff] }
  0xb4   :  { %4533 = vmatpush.bf16.msrb.mxu2 %v7320_v31  ;;  %v7334_v31 = vld [vmem:[%s9467_s1 + $0x608] sm:$0xff] }
  0xb5   :  { %4546 = vmatpush.bf16.msrb.mxu3 %v7328_v32  ;;  %v7342_v32 = vld [vmem:[%s9467_s1 + $0x648] sm:$0xff] }
  0xb6   :  { %4508 = vmatpush.bf16.msrb.mxu0 %v7303_v37  ;;  %v7333_v37 = vld [vmem:[%s9467_s1 + $0x600] sm:$0xff] }
  0xb7   :  { %4521 = vmatpush.bf16.msrb.mxu1 %v7311_v38  ;;  %v7341_v38 = vld [vmem:[%s9467_s1 + $0x640] sm:$0xff] }
  0xb8   :  { %4534 = vmatpush.bf16.msrb.mxu2 %v7319_v41  ;;  %v7372_v41 = vld [vmem:[%s9467_s1 + $0x738] sm:$0xff] }
  0xb9   :  { %4547 = vmatpush.bf16.msrb.mxu3 %v7327_v42  ;;  %v39_v42 = vld [vmem:[%s9466_s0 + $0xc0] sm:$0xff] }
  0xba   :  { %4509 = vmatpush.bf16.msrb.mxu0 %v7302_v43  ;;  %v41_v43 = vld [vmem:[%s9466_s0 + $0xd0] sm:$0xff] }
  0xbb   :  { %4522 = vmatpush.bf16.msrb.mxu1 %v7310_v44  ;;  %v7380_v44 = vld [vmem:[%s9467_s1 + $0x778] sm:$0xff] }
  0xbc   :  { %4535 = vmatpush.bf16.msrb.mxu2 %v7318_v45  ;;  %v40_v45 = vld [vmem:[%s9466_s0 + $0xc8] sm:$0xff] }
  0xbd   :  { %4548 = vmatpush.bf16.msrb.mxu3 %v7326_v46  ;;  %v42_v46 = vld [vmem:[%s9466_s0 + $0xd8] sm:$0xff] }
  0xbe   :  { %4510 = vmatpush.bf16.msrb.mxu0 %v7301_v49  ;;  %v4304_v9 = vpop.f32.mrf.mxu0  ;;  %v103_v49 = vpack.c.bf16 %v39_v42, %v39_v42  ;;  %v7411_v42 = vld [vmem:[%s9467_s1 + $0x870] sm:$0xff] }
  0xbf   :  { %4523 = vmatpush.bf16.msrb.mxu1 %v7309_v50  ;;  %v4305_v12 = vadd.f32 %v4304_v9, %v8311_v39  ;;  %v4317_v13 = vpop.f32.mrf.mxu1  ;;  %v7349_v39 = vld [vmem:[%s9467_s1 + $0x680] sm:$0xff]  ;;  %v105_v50 = vpack.c.bf16 %v41_v43, %v41_v43  ;;  %v7419_v43 = vld [vmem:[%s9467_s1 + $0x8b0] sm:$0xff] }
  0xc0   :  { %4536 = vmatpush.bf16.msrb.mxu2 %v7317_v51  ;;  %v104_v51 = vpack.c.bf16 %v40_v45, %v40_v45  ;;  %v7402_v45 = vld [vmem:[%s9467_s1 + $0x828] sm:$0xff] }
  0xc1   :  { %4549 = vmatpush.bf16.msrb.mxu3 %v7325_v52  ;;  %4511 = vmatmul.bf16.vlgmr.msrb.gmra.mxu0 %v99_v61  ;;  %v4318_v16 = vadd.f32 %v4317_v13, %v4305_v12  ;;  %v106_v52 = vpack.c.bf16 %v42_v46, %v42_v46  ;;  %v7410_v46 = vld [vmem:[%s9467_s1 + $0x868] sm:$0xff] }
  0xc2   :  { %4555 = vmatpush.bf16.msra.mxu0 %v7340_v53  ;;  %4524 = vmatmul.bf16.vlgmr.msrb.gmra.mxu1 %v100_v63  ;;  %v7371_v53 = vld [vmem:[%s9467_s1 + $0x730] sm:$0xff]  ;;  %v7369_v63 = vld [vmem:[%s9467_s1 + $0x720] sm:$0xff] }
  0xc3   :  { %4568 = vmatpush.bf16.msra.mxu1 %v7348_v56  ;;  %4537 = vmatmul.bf16.vlgmr.msrb.gmra.mxu2 %v101_v62  ;;  %v7395_v56 = vld [vmem:[%s9467_s1 + $0x7f0] sm:$0xff] }
  0xc4   :  { %4581 = vmatpush.bf16.msra.mxu2 %v7356_v59  ;;  %4550 = vmatmul.bf16.vlgmr.msrb.gmra.mxu3 %v102_v0  ;;  %v7386_v59 = vld [vmem:[%s9467_s1 + $0x7a8] sm:$0xff]  ;;  %v7377_v0 = vld [vmem:[%s9467_s1 + $0x760] sm:$0xff] }
  0xc5   :  { %4594 = vmatpush.bf16.msra.mxu3 %v7364_v60  ;;  %v7394_v60 = vld [vmem:[%s9467_s1 + $0x7e8] sm:$0xff] }
  0xc6   :  { %4556 = vmatpush.bf16.msra.mxu0 %v7339_v1  ;;  %v4330_v21 = vpop.f32.mrf.mxu2  ;;  %v4306_v24 = vpop.f32.mrf.mxu0 }
  0xc7   :  { %4569 = vmatpush.bf16.msra.mxu1 %v7347_v2  ;;  %v4331_v22 = vadd.f32 %v4330_v21, %v4318_v16  ;;  %v4343_v23 = vpop.f32.mrf.mxu3  ;;  %v4319_v28 = vpop.f32.mrf.mxu1  ;;  %v7385_v2 = vld [vmem:[%s9467_s1 + $0x7a0] sm:$0xff]  ;;  %v7382_v21 = vld [vmem:[%s9467_s1 + $0x788] sm:$0xff] }
  0xc8   :  { %4582 = vmatpush.bf16.msra.mxu2 %v7355_v3  ;;  %v7393_v3 = vld [vmem:[%s9467_s1 + $0x7e0] sm:$0xff] }
  0xc9   :  { %4595 = vmatpush.bf16.msra.mxu3 %v7363_v4  ;;  %v8422_v27 = vadd.f32 %v4343_v23, %v4331_v22  ;;  %v7390_v22 = vld [vmem:[%s9467_s1 + $0x7c8] sm:$0xff]  ;;  %v7389_v28 = vld [vmem:[%s9467_s1 + $0x7c0] sm:$0xff] }
  0xca   :  { %4557 = vmatpush.bf16.msra.mxu0 %v7338_v5  ;;  %v7368_v5 = vld [vmem:[%s9467_s1 + $0x718] sm:$0xff] }
  0xcb   :  { %4570 = vmatpush.bf16.msra.mxu1 %v7346_v6  ;;  %v7376_v6 = vld [vmem:[%s9467_s1 + $0x758] sm:$0xff] }
  0xcc   :  { %4583 = vmatpush.bf16.msra.mxu2 %v7354_v7  ;;  %v7384_v7 = vld [vmem:[%s9467_s1 + $0x798] sm:$0xff] }
  0xcd   :  { %4596 = vmatpush.bf16.msra.mxu3 %v7362_v8  ;;  %v7392_v8 = vld [vmem:[%s9467_s1 + $0x7d8] sm:$0xff] }
  0xce   :  { %4558 = vmatpush.bf16.msra.mxu0 %v7337_v10  ;;  %v4332_v35 = vpop.f32.mrf.mxu2 }
  0xcf   :  { %4571 = vmatpush.bf16.msra.mxu1 %v7345_v11  ;;  %v4345_v36 = vpop.f32.mrf.mxu3  ;;  %v7420_v35 = vld [vmem:[%s9467_s1 + $0x8b8] sm:$0xff] }
  0xd0   :  { %4584 = vmatpush.bf16.msra.mxu2 %v7353_v14  ;;  %v7367_v14 = vld [vmem:[%s9467_s1 + $0x710] sm:$0xff]  ;;  %v7428_v36 = vld [vmem:[%s9467_s1 + $0x8f8] sm:$0xff] }
  0xd1   :  { %4597 = vmatpush.bf16.msra.mxu3 %v7361_v15  ;;  %v7375_v15 = vld [vmem:[%s9467_s1 + $0x750] sm:$0xff] }
  0xd2   :  { %4559 = vmatpush.bf16.msra.mxu0 %v7336_v17  ;;  %v7383_v17 = vld [vmem:[%s9467_s1 + $0x790] sm:$0xff] }
  0xd3   :  { %4572 = vmatpush.bf16.msra.mxu1 %v7344_v18  ;;  %v7391_v18 = vld [vmem:[%s9467_s1 + $0x7d0] sm:$0xff] }
  0xd4   :  { %4585 = vmatpush.bf16.msra.mxu2 %v7352_v19  ;;  %v7366_v19 = vld [vmem:[%s9467_s1 + $0x708] sm:$0xff] }
  0xd5   :  { %4598 = vmatpush.bf16.msra.mxu3 %v7360_v20  ;;  %v7374_v20 = vld [vmem:[%s9467_s1 + $0x748] sm:$0xff] }
  0xd6   :  { %4560 = vmatpush.bf16.msra.mxu0 %v7335_v25  ;;  %v7365_v25 = vld [vmem:[%s9467_s1 + $0x700] sm:$0xff] }
  0xd7   :  { %4573 = vmatpush.bf16.msra.mxu1 %v7343_v26  ;;  %v7373_v26 = vld [vmem:[%s9467_s1 + $0x740] sm:$0xff] }
  0xd8   :  { %4586 = vmatpush.bf16.msra.mxu2 %v7351_v29  ;;  %v7404_v29 = vld [vmem:[%s9467_s1 + $0x838] sm:$0xff] }
  0xd9   :  { %4599 = vmatpush.bf16.msra.mxu3 %v7359_v30  ;;  %v43_v30 = vld [vmem:[%s9466_s0 + $0xe0] sm:$0xff] }
  0xda   :  { %4561 = vmatpush.bf16.msra.mxu0 %v7334_v31  ;;  %v45_v31 = vld [vmem:[%s9466_s0 + $0xf0] sm:$0xff] }
  0xdb   :  { %4574 = vmatpush.bf16.msra.mxu1 %v7342_v32  ;;  %v7412_v32 = vld [vmem:[%s9467_s1 + $0x878] sm:$0xff] }
  0xdc   :  { %4587 = vmatpush.bf16.msra.mxu2 %v7350_v33  ;;  %v44_v33 = vld [vmem:[%s9466_s0 + $0xe8] sm:$0xff] }
  0xdd   :  { %4600 = vmatpush.bf16.msra.mxu3 %v7358_v34  ;;  %v46_v34 = vld [vmem:[%s9466_s0 + $0xf8] sm:$0xff] }
  0xde   :  { %4562 = vmatpush.bf16.msra.mxu0 %v7333_v37  ;;  %v4356_v61 = vpop.f32.mrf.mxu0  ;;  %v107_v37 = vpack.c.bf16 %v43_v30, %v43_v30  ;;  %v7443_v30 = vld [vmem:[%s9467_s1 + $0x970] sm:$0xff] }
  0xdf   :  { %4575 = vmatpush.bf16.msra.mxu1 %v7341_v38  ;;  %v4357_v62 = vadd.f32 %v4356_v61, %v8422_v27  ;;  %v4369_v1 = vpop.f32.mrf.mxu1  ;;  %v7381_v27 = vld [vmem:[%s9467_s1 + $0x780] sm:$0xff]  ;;  %v109_v38 = vpack.c.bf16 %v45_v31, %v45_v31  ;;  %v7451_v31 = vld [vmem:[%s9467_s1 + $0x9b0] sm:$0xff] }
  0xe0   :  { %4588 = vmatpush.bf16.msra.mxu2 %v7349_v39  ;;  %v108_v39 = vpack.c.bf16 %v44_v33, %v44_v33  ;;  %v7434_v33 = vld [vmem:[%s9467_s1 + $0x928] sm:$0xff] }
  0xe1   :  { %4601 = vmatpush.bf16.msra.mxu3 %v7357_v40  ;;  %4563 = vmatmul.bf16.vlgmr.msra.gmra.mxu0 %v103_v49  ;;  %v4370_v4 = vadd.f32 %v4369_v1, %v4357_v62  ;;  %v110_v40 = vpack.c.bf16 %v46_v34, %v46_v34  ;;  %v7442_v34 = vld [vmem:[%s9467_s1 + $0x968] sm:$0xff] }
  0xe2   :  { %4607 = vmatpush.bf16.msrb.mxu0 %v7372_v41  ;;  %4576 = vmatmul.bf16.vlgmr.msra.gmra.mxu1 %v104_v51  ;;  %v7403_v41 = vld [vmem:[%s9467_s1 + $0x830] sm:$0xff]  ;;  %v7401_v51 = vld [vmem:[%s9467_s1 + $0x820] sm:$0xff] }
  0xe3   :  { %4620 = vmatpush.bf16.msrb.mxu1 %v7380_v44  ;;  %4589 = vmatmul.bf16.vlgmr.msra.gmra.mxu2 %v105_v50  ;;  %v7427_v44 = vld [vmem:[%s9467_s1 + $0x8f0] sm:$0xff] }
  0xe4   :  { %4633 = vmatpush.bf16.msrb.mxu2 %v7388_v47  ;;  %4602 = vmatmul.bf16.vlgmr.msra.gmra.mxu3 %v106_v52  ;;  %v7418_v47 = vld [vmem:[%s9467_s1 + $0x8a8] sm:$0xff]  ;;  %v7409_v52 = vld [vmem:[%s9467_s1 + $0x860] sm:$0xff] }
  0xe5   :  { %4646 = vmatpush.bf16.msrb.mxu3 %v7396_v48  ;;  %v7426_v48 = vld [vmem:[%s9467_s1 + $0x8e8] sm:$0xff] }
  0xe6   :  { %4608 = vmatpush.bf16.msrb.mxu0 %v7371_v53  ;;  %v4382_v9 = vpop.f32.mrf.mxu2  ;;  %v4358_v12 = vpop.f32.mrf.mxu0 }
  0xe7   :  { %4621 = vmatpush.bf16.msrb.mxu1 %v7379_v54  ;;  %v4383_v10 = vadd.f32 %v4382_v9, %v4370_v4  ;;  %v4395_v11 = vpop.f32.mrf.mxu3  ;;  %v4371_v16 = vpop.f32.mrf.mxu1  ;;  %v7417_v54 = vld [vmem:[%s9467_s1 + $0x8a0] sm:$0xff]  ;;  %v7414_v9 = vld [vmem:[%s9467_s1 + $0x888] sm:$0xff] }
  0xe8   :  { %4634 = vmatpush.bf16.msrb.mxu2 %v7387_v55  ;;  %v7425_v55 = vld [vmem:[%s9467_s1 + $0x8e0] sm:$0xff] }
  0xe9   :  { %4647 = vmatpush.bf16.msrb.mxu3 %v7395_v56  ;;  %v8527_v13 = vadd.f32 %v4395_v11, %v4383_v10  ;;  %v7422_v10 = vld [vmem:[%s9467_s1 + $0x8c8] sm:$0xff]  ;;  %v7421_v16 = vld [vmem:[%s9467_s1 + $0x8c0] sm:$0xff] }
  0xea   :  { %4609 = vmatpush.bf16.msrb.mxu0 %v7370_v57  ;;  %v7400_v57 = vld [vmem:[%s9467_s1 + $0x818] sm:$0xff] }
  0xeb   :  { %4622 = vmatpush.bf16.msrb.mxu1 %v7378_v58  ;;  %v7408_v58 = vld [vmem:[%s9467_s1 + $0x858] sm:$0xff] }
  0xec   :  { %4635 = vmatpush.bf16.msrb.mxu2 %v7386_v59  ;;  %v7416_v59 = vld [vmem:[%s9467_s1 + $0x898] sm:$0xff] }
  0xed   :  { %4648 = vmatpush.bf16.msrb.mxu3 %v7394_v60  ;;  %v7424_v60 = vld [vmem:[%s9467_s1 + $0x8d8] sm:$0xff] }
  0xee   :  { %4610 = vmatpush.bf16.msrb.mxu0 %v7369_v63  ;;  %v4384_v23 = vpop.f32.mrf.mxu2 }
  0xef   :  { %4623 = vmatpush.bf16.msrb.mxu1 %v7377_v0  ;;  %v4397_v24 = vpop.f32.mrf.mxu3  ;;  %v7452_v23 = vld [vmem:[%s9467_s1 + $0x9b8] sm:$0xff] }
  0xf0   :  { %4636 = vmatpush.bf16.msrb.mxu2 %v7385_v2  ;;  %v7399_v2 = vld [vmem:[%s9467_s1 + $0x810] sm:$0xff]  ;;  %v7460_v24 = vld [vmem:[%s9467_s1 + $0x9f8] sm:$0xff] }
  0xf1   :  { %4649 = vmatpush.bf16.msrb.mxu3 %v7393_v3  ;;  %v7407_v3 = vld [vmem:[%s9467_s1 + $0x850] sm:$0xff] }
  0xf2   :  { %4611 = vmatpush.bf16.msrb.mxu0 %v7368_v5  ;;  %v7415_v5 = vld [vmem:[%s9467_s1 + $0x890] sm:$0xff] }
  0xf3   :  { %4624 = vmatpush.bf16.msrb.mxu1 %v7376_v6  ;;  %v7423_v6 = vld [vmem:[%s9467_s1 + $0x8d0] sm:$0xff] }
  0xf4   :  { %4637 = vmatpush.bf16.msrb.mxu2 %v7384_v7  ;;  %v7398_v7 = vld [vmem:[%s9467_s1 + $0x808] sm:$0xff] }
  0xf5   :  { %4650 = vmatpush.bf16.msrb.mxu3 %v7392_v8  ;;  %v7406_v8 = vld [vmem:[%s9467_s1 + $0x848] sm:$0xff] }
  0xf6   :  { %4612 = vmatpush.bf16.msrb.mxu0 %v7367_v14  ;;  %v7405_v14 = vld [vmem:[%s9467_s1 + $0x840] sm:$0xff] }
  0xf7   :  { %4625 = vmatpush.bf16.msrb.mxu1 %v7375_v15  ;;  %v7413_v15 = vld [vmem:[%s9467_s1 + $0x880] sm:$0xff] }
  0xf8   :  { %4638 = vmatpush.bf16.msrb.mxu2 %v7383_v17  ;;  %v7436_v17 = vld [vmem:[%s9467_s1 + $0x938] sm:$0xff] }
  0xf9   :  { %4651 = vmatpush.bf16.msrb.mxu3 %v7391_v18  ;;  %v47_v18 = vld [vmem:[%s9466_s0 + $0x100] sm:$0xff] }
  0xfa   :  { %4613 = vmatpush.bf16.msrb.mxu0 %v7366_v19  ;;  %v49_v19 = vld [vmem:[%s9466_s0 + $0x110] sm:$0xff] }
  0xfb   :  { %4626 = vmatpush.bf16.msrb.mxu1 %v7374_v20  ;;  %v7444_v20 = vld [vmem:[%s9467_s1 + $0x978] sm:$0xff] }
  0xfc   :  { %4639 = vmatpush.bf16.msrb.mxu2 %v7382_v21  ;;  %v48_v21 = vld [vmem:[%s9466_s0 + $0x108] sm:$0xff] }
  0xfd   :  { %4652 = vmatpush.bf16.msrb.mxu3 %v7390_v22  ;;  %v50_v22 = vld [vmem:[%s9466_s0 + $0x118] sm:$0xff] }
  0xfe   :  { %4614 = vmatpush.bf16.msrb.mxu0 %v7365_v25  ;;  %v4408_v49 = vpop.f32.mrf.mxu0  ;;  %v111_v25 = vpack.c.bf16 %v47_v18, %v47_v18  ;;  %v7475_v18 = vld [vmem:[%s9467_s1 + $0xa70] sm:$0xff] }
  0xff   :  { %4627 = vmatpush.bf16.msrb.mxu1 %v7373_v26  ;;  %v4409_v50 = vadd.f32 %v4408_v49, %v8527_v13  ;;  %v4421_v53 = vpop.f32.mrf.mxu1  ;;  %v7397_v13 = vld [vmem:[%s9467_s1 + $0x800] sm:$0xff]  ;;  %v113_v26 = vpack.c.bf16 %v49_v19, %v49_v19  ;;  %v7483_v19 = vld [vmem:[%s9467_s1 + $0xab0] sm:$0xff] }
 0x100   :  { %4640 = vmatpush.bf16.msrb.mxu2 %v7381_v27  ;;  %v112_v27 = vpack.c.bf16 %v48_v21, %v48_v21  ;;  %v7466_v21 = vld [vmem:[%s9467_s1 + $0xa28] sm:$0xff] }
 0x101   :  { %4653 = vmatpush.bf16.msrb.mxu3 %v7389_v28  ;;  %4615 = vmatmul.bf16.vlgmr.msrb.gmra.mxu0 %v107_v37  ;;  %v4422_v56 = vadd.f32 %v4421_v53, %v4409_v50  ;;  %v114_v28 = vpack.c.bf16 %v50_v22, %v50_v22  ;;  %v7474_v22 = vld [vmem:[%s9467_s1 + $0xa68] sm:$0xff] }
 0x102   :  { %4659 = vmatpush.bf16.msra.mxu0 %v7404_v29  ;;  %4628 = vmatmul.bf16.vlgmr.msrb.gmra.mxu1 %v108_v39  ;;  %v7435_v29 = vld [vmem:[%s9467_s1 + $0x930] sm:$0xff]  ;;  %v7433_v39 = vld [vmem:[%s9467_s1 + $0x920] sm:$0xff] }
 0x103   :  { %4672 = vmatpush.bf16.msra.mxu1 %v7412_v32  ;;  %4641 = vmatmul.bf16.vlgmr.msrb.gmra.mxu2 %v109_v38  ;;  %v7459_v32 = vld [vmem:[%s9467_s1 + $0x9f0] sm:$0xff] }
 0x104   :  { %4685 = vmatpush.bf16.msra.mxu2 %v7420_v35  ;;  %4654 = vmatmul.bf16.vlgmr.msrb.gmra.mxu3 %v110_v40  ;;  %v7450_v35 = vld [vmem:[%s9467_s1 + $0x9a8] sm:$0xff]  ;;  %v7441_v40 = vld [vmem:[%s9467_s1 + $0x960] sm:$0xff] }
 0x105   :  { %4698 = vmatpush.bf16.msra.mxu3 %v7428_v36  ;;  %v7458_v36 = vld [vmem:[%s9467_s1 + $0x9e8] sm:$0xff] }
 0x106   :  { %4660 = vmatpush.bf16.msra.mxu0 %v7403_v41  ;;  %v4434_v61 = vpop.f32.mrf.mxu2  ;;  %v4410_v0 = vpop.f32.mrf.mxu0 }
 0x107   :  { %4673 = vmatpush.bf16.msra.mxu1 %v7411_v42  ;;  %v4435_v62 = vadd.f32 %v4434_v61, %v4422_v56  ;;  %v4447_v63 = vpop.f32.mrf.mxu3  ;;  %v4423_v4 = vpop.f32.mrf.mxu1  ;;  %v7449_v42 = vld [vmem:[%s9467_s1 + $0x9a0] sm:$0xff]  ;;  %v7446_v61 = vld [vmem:[%s9467_s1 + $0x988] sm:$0xff] }
 0x108   :  { %4686 = vmatpush.bf16.msra.mxu2 %v7419_v43  ;;  %v7457_v43 = vld [vmem:[%s9467_s1 + $0x9e0] sm:$0xff] }
 0x109   :  { %4699 = vmatpush.bf16.msra.mxu3 %v7427_v44  ;;  %v8638_v1 = vadd.f32 %v4447_v63, %v4435_v62  ;;  %v7454_v62 = vld [vmem:[%s9467_s1 + $0x9c8] sm:$0xff]  ;;  %v7453_v4 = vld [vmem:[%s9467_s1 + $0x9c0] sm:$0xff] }
 0x10a   :  { %4661 = vmatpush.bf16.msra.mxu0 %v7402_v45  ;;  %v7432_v45 = vld [vmem:[%s9467_s1 + $0x918] sm:$0xff] }
 0x10b   :  { %4674 = vmatpush.bf16.msra.mxu1 %v7410_v46  ;;  %v7440_v46 = vld [vmem:[%s9467_s1 + $0x958] sm:$0xff] }
 0x10c   :  { %4687 = vmatpush.bf16.msra.mxu2 %v7418_v47  ;;  %v7448_v47 = vld [vmem:[%s9467_s1 + $0x998] sm:$0xff] }
 0x10d   :  { %4700 = vmatpush.bf16.msra.mxu3 %v7426_v48  ;;  %v7456_v48 = vld [vmem:[%s9467_s1 + $0x9d8] sm:$0xff] }
 0x10e   :  { %4662 = vmatpush.bf16.msra.mxu0 %v7401_v51  ;;  %v4436_v11 = vpop.f32.mrf.mxu2 }
 0x10f   :  { %4675 = vmatpush.bf16.msra.mxu1 %v7409_v52  ;;  %v4449_v12 = vpop.f32.mrf.mxu3  ;;  %v7484_v11 = vld [vmem:[%s9467_s1 + $0xab8] sm:$0xff] }
 0x110   :  { %4688 = vmatpush.bf16.msra.mxu2 %v7417_v54  ;;  %v7431_v54 = vld [vmem:[%s9467_s1 + $0x910] sm:$0xff]  ;;  %v7492_v12 = vld [vmem:[%s9467_s1 + $0xaf8] sm:$0xff] }
 0x111   :  { %4701 = vmatpush.bf16.msra.mxu3 %v7425_v55  ;;  %v7439_v55 = vld [vmem:[%s9467_s1 + $0x950] sm:$0xff] }
 0x112   :  { %4663 = vmatpush.bf16.msra.mxu0 %v7400_v57  ;;  %v7447_v57 = vld [vmem:[%s9467_s1 + $0x990] sm:$0xff] }
 0x113   :  { %4676 = vmatpush.bf16.msra.mxu1 %v7408_v58  ;;  %v7455_v58 = vld [vmem:[%s9467_s1 + $0x9d0] sm:$0xff] }
 0x114   :  { %4689 = vmatpush.bf16.msra.mxu2 %v7416_v59  ;;  %v7430_v59 = vld [vmem:[%s9467_s1 + $0x908] sm:$0xff] }
 0x115   :  { %4702 = vmatpush.bf16.msra.mxu3 %v7424_v60  ;;  %v7438_v60 = vld [vmem:[%s9467_s1 + $0x948] sm:$0xff] }
 0x116   :  { %4664 = vmatpush.bf16.msra.mxu0 %v7399_v2  ;;  %v7437_v2 = vld [vmem:[%s9467_s1 + $0x940] sm:$0xff] }
 0x117   :  { %4677 = vmatpush.bf16.msra.mxu1 %v7407_v3  ;;  %v7445_v3 = vld [vmem:[%s9467_s1 + $0x980] sm:$0xff] }
 0x118   :  { %4690 = vmatpush.bf16.msra.mxu2 %v7415_v5  ;;  %v7468_v5 = vld [vmem:[%s9467_s1 + $0xa38] sm:$0xff] }
 0x119   :  { %4703 = vmatpush.bf16.msra.mxu3 %v7423_v6  ;;  %v51_v6 = vld [vmem:[%s9466_s0 + $0x120] sm:$0xff] }
 0x11a   :  { %4665 = vmatpush.bf16.msra.mxu0 %v7398_v7  ;;  %v53_v7 = vld [vmem:[%s9466_s0 + $0x130] sm:$0xff] }
 0x11b   :  { %4678 = vmatpush.bf16.msra.mxu1 %v7406_v8  ;;  %v7476_v8 = vld [vmem:[%s9467_s1 + $0xa78] sm:$0xff] }
 0x11c   :  { %4691 = vmatpush.bf16.msra.mxu2 %v7414_v9  ;;  %v52_v9 = vld [vmem:[%s9466_s0 + $0x128] sm:$0xff] }
 0x11d   :  { %4704 = vmatpush.bf16.msra.mxu3 %v7422_v10  ;;  %v54_v10 = vld [vmem:[%s9466_s0 + $0x138] sm:$0xff] }
 0x11e   :  { %4666 = vmatpush.bf16.msra.mxu0 %v7397_v13  ;;  %v4460_v37 = vpop.f32.mrf.mxu0  ;;  %v115_v13 = vpack.c.bf16 %v51_v6, %v51_v6  ;;  %v7507_v6 = vld [vmem:[%s9467_s1 + $0xb70] sm:$0xff] }
 0x11f   :  { %4679 = vmatpush.bf16.msra.mxu1 %v7405_v14  ;;  %v4461_v38 = vadd.f32 %v4460_v37, %v8638_v1  ;;  %v4473_v41 = vpop.f32.mrf.mxu1  ;;  %v7429_v1 = vld [vmem:[%s9467_s1 + $0x900] sm:$0xff]  ;;  %v117_v14 = vpack.c.bf16 %v53_v7, %v53_v7  ;;  %v7515_v7 = vld [vmem:[%s9467_s1 + $0xbb0] sm:$0xff] }
 0x120   :  { %4692 = vmatpush.bf16.msra.mxu2 %v7413_v15  ;;  %v116_v15 = vpack.c.bf16 %v52_v9, %v52_v9  ;;  %v7498_v9 = vld [vmem:[%s9467_s1 + $0xb28] sm:$0xff] }
 0x121   :  { %4705 = vmatpush.bf16.msra.mxu3 %v7421_v16  ;;  %4667 = vmatmul.bf16.vlgmr.msra.gmra.mxu0 %v111_v25  ;;  %v4474_v44 = vadd.f32 %v4473_v41, %v4461_v38  ;;  %v118_v16 = vpack.c.bf16 %v54_v10, %v54_v10  ;;  %v7506_v10 = vld [vmem:[%s9467_s1 + $0xb68] sm:$0xff] }
 0x122   :  { %4711 = vmatpush.bf16.msrb.mxu0 %v7436_v17  ;;  %4680 = vmatmul.bf16.vlgmr.msra.gmra.mxu1 %v112_v27  ;;  %v7467_v17 = vld [vmem:[%s9467_s1 + $0xa30] sm:$0xff]  ;;  %v7465_v27 = vld [vmem:[%s9467_s1 + $0xa20] sm:$0xff] }
 0x123   :  { %4724 = vmatpush.bf16.msrb.mxu1 %v7444_v20  ;;  %4693 = vmatmul.bf16.vlgmr.msra.gmra.mxu2 %v113_v26  ;;  %v7491_v20 = vld [vmem:[%s9467_s1 + $0xaf0] sm:$0xff] }
 0x124   :  { %4737 = vmatpush.bf16.msrb.mxu2 %v7452_v23  ;;  %4706 = vmatmul.bf16.vlgmr.msra.gmra.mxu3 %v114_v28  ;;  %v7482_v23 = vld [vmem:[%s9467_s1 + $0xaa8] sm:$0xff]  ;;  %v7473_v28 = vld [vmem:[%s9467_s1 + $0xa60] sm:$0xff] }
 0x125   :  { %4750 = vmatpush.bf16.msrb.mxu3 %v7460_v24  ;;  %v7490_v24 = vld [vmem:[%s9467_s1 + $0xae8] sm:$0xff] }
 0x126   :  { %4712 = vmatpush.bf16.msrb.mxu0 %v7435_v29  ;;  %v4486_v49 = vpop.f32.mrf.mxu2  ;;  %v4462_v52 = vpop.f32.mrf.mxu0 }
 0x127   :  { %4725 = vmatpush.bf16.msrb.mxu1 %v7443_v30  ;;  %v4487_v50 = vadd.f32 %v4486_v49, %v4474_v44  ;;  %v4499_v51 = vpop.f32.mrf.mxu3  ;;  %v4475_v56 = vpop.f32.mrf.mxu1  ;;  %v7481_v30 = vld [vmem:[%s9467_s1 + $0xaa0] sm:$0xff]  ;;  %v7478_v49 = vld [vmem:[%s9467_s1 + $0xa88] sm:$0xff] }
 0x128   :  { %4738 = vmatpush.bf16.msrb.mxu2 %v7451_v31  ;;  %v7489_v31 = vld [vmem:[%s9467_s1 + $0xae0] sm:$0xff] }
 0x129   :  { %4751 = vmatpush.bf16.msrb.mxu3 %v7459_v32  ;;  %v8749_v53 = vadd.f32 %v4499_v51, %v4487_v50  ;;  %v7486_v50 = vld [vmem:[%s9467_s1 + $0xac8] sm:$0xff]  ;;  %v7485_v56 = vld [vmem:[%s9467_s1 + $0xac0] sm:$0xff] }
 0x12a   :  { %4713 = vmatpush.bf16.msrb.mxu0 %v7434_v33  ;;  %v7464_v33 = vld [vmem:[%s9467_s1 + $0xa18] sm:$0xff] }
 0x12b   :  { %4726 = vmatpush.bf16.msrb.mxu1 %v7442_v34  ;;  %v7472_v34 = vld [vmem:[%s9467_s1 + $0xa58] sm:$0xff] }
 0x12c   :  { %4739 = vmatpush.bf16.msrb.mxu2 %v7450_v35  ;;  %v7480_v35 = vld [vmem:[%s9467_s1 + $0xa98] sm:$0xff] }
 0x12d   :  { %4752 = vmatpush.bf16.msrb.mxu3 %v7458_v36  ;;  %v7488_v36 = vld [vmem:[%s9467_s1 + $0xad8] sm:$0xff] }
 0x12e   :  { %4714 = vmatpush.bf16.msrb.mxu0 %v7433_v39  ;;  %v4488_v63 = vpop.f32.mrf.mxu2 }
 0x12f   :  { %4727 = vmatpush.bf16.msrb.mxu1 %v7441_v40  ;;  %v4501_v0 = vpop.f32.mrf.mxu3  ;;  %v7516_v63 = vld [vmem:[%s9467_s1 + $0xbb8] sm:$0xff] }
 0x130   :  { %4740 = vmatpush.bf16.msrb.mxu2 %v7449_v42  ;;  %v7463_v42 = vld [vmem:[%s9467_s1 + $0xa10] sm:$0xff]  ;;  %v7524_v0 = vld [vmem:[%s9467_s1 + $0xbf8] sm:$0xff] }
 0x131   :  { %4753 = vmatpush.bf16.msrb.mxu3 %v7457_v43  ;;  %v7471_v43 = vld [vmem:[%s9467_s1 + $0xa50] sm:$0xff] }
 0x132   :  { %4715 = vmatpush.bf16.msrb.mxu0 %v7432_v45  ;;  %v7479_v45 = vld [vmem:[%s9467_s1 + $0xa90] sm:$0xff] }
 0x133   :  { %4728 = vmatpush.bf16.msrb.mxu1 %v7440_v46  ;;  %v7487_v46 = vld [vmem:[%s9467_s1 + $0xad0] sm:$0xff] }
 0x134   :  { %4741 = vmatpush.bf16.msrb.mxu2 %v7448_v47  ;;  %v7462_v47 = vld [vmem:[%s9467_s1 + $0xa08] sm:$0xff] }
 0x135   :  { %4754 = vmatpush.bf16.msrb.mxu3 %v7456_v48  ;;  %v7470_v48 = vld [vmem:[%s9467_s1 + $0xa48] sm:$0xff] }
 0x136   :  { %4716 = vmatpush.bf16.msrb.mxu0 %v7431_v54  ;;  %v7469_v54 = vld [vmem:[%s9467_s1 + $0xa40] sm:$0xff] }
 0x137   :  { %4729 = vmatpush.bf16.msrb.mxu1 %v7439_v55  ;;  %v7477_v55 = vld [vmem:[%s9467_s1 + $0xa80] sm:$0xff] }
 0x138   :  { %4742 = vmatpush.bf16.msrb.mxu2 %v7447_v57  ;;  %v7500_v57 = vld [vmem:[%s9467_s1 + $0xb38] sm:$0xff] }
 0x139   :  { %4755 = vmatpush.bf16.msrb.mxu3 %v7455_v58  ;;  %v55_v58 = vld [vmem:[%s9466_s0 + $0x140] sm:$0xff] }
 0x13a   :  { %4717 = vmatpush.bf16.msrb.mxu0 %v7430_v59  ;;  %v57_v59 = vld [vmem:[%s9466_s0 + $0x150] sm:$0xff] }
 0x13b   :  { %4730 = vmatpush.bf16.msrb.mxu1 %v7438_v60  ;;  %v7508_v60 = vld [vmem:[%s9467_s1 + $0xb78] sm:$0xff] }
 0x13c   :  { %4743 = vmatpush.bf16.msrb.mxu2 %v7446_v61  ;;  %v56_v61 = vld [vmem:[%s9466_s0 + $0x148] sm:$0xff] }
 0x13d   :  { %4756 = vmatpush.bf16.msrb.mxu3 %v7454_v62  ;;  %v58_v62 = vld [vmem:[%s9466_s0 + $0x158] sm:$0xff] }
 0x13e   :  { %4718 = vmatpush.bf16.msrb.mxu0 %v7429_v1  ;;  %v4512_v25 = vpop.f32.mrf.mxu0  ;;  %v119_v1 = vpack.c.bf16 %v55_v58, %v55_v58  ;;  %v7539_v58 = vld [vmem:[%s9467_s1 + $0xc70] sm:$0xff] }
 0x13f   :  { %4731 = vmatpush.bf16.msrb.mxu1 %v7437_v2  ;;  %v4513_v26 = vadd.f32 %v4512_v25, %v8749_v53  ;;  %v4525_v29 = vpop.f32.mrf.mxu1  ;;  %v7461_v53 = vld [vmem:[%s9467_s1 + $0xa00] sm:$0xff]  ;;  %v121_v2 = vpack.c.bf16 %v57_v59, %v57_v59  ;;  %v7547_v59 = vld [vmem:[%s9467_s1 + $0xcb0] sm:$0xff] }
 0x140   :  { %4744 = vmatpush.bf16.msrb.mxu2 %v7445_v3  ;;  %v120_v3 = vpack.c.bf16 %v56_v61, %v56_v61  ;;  %v7530_v61 = vld [vmem:[%s9467_s1 + $0xc28] sm:$0xff] }
 0x141   :  { %4757 = vmatpush.bf16.msrb.mxu3 %v7453_v4  ;;  %4719 = vmatmul.bf16.vlgmr.msrb.gmra.mxu0 %v115_v13  ;;  %v4526_v32 = vadd.f32 %v4525_v29, %v4513_v26  ;;  %v122_v4 = vpack.c.bf16 %v58_v62, %v58_v62  ;;  %v7538_v62 = vld [vmem:[%s9467_s1 + $0xc68] sm:$0xff] }
 0x142   :  { %4763 = vmatpush.bf16.msra.mxu0 %v7468_v5  ;;  %4732 = vmatmul.bf16.vlgmr.msrb.gmra.mxu1 %v116_v15  ;;  %v7499_v5 = vld [vmem:[%s9467_s1 + $0xb30] sm:$0xff]  ;;  %v7497_v15 = vld [vmem:[%s9467_s1 + $0xb20] sm:$0xff] }
 0x143   :  { %4776 = vmatpush.bf16.msra.mxu1 %v7476_v8  ;;  %4745 = vmatmul.bf16.vlgmr.msrb.gmra.mxu2 %v117_v14  ;;  %v7523_v8 = vld [vmem:[%s9467_s1 + $0xbf0] sm:$0xff] }
 0x144   :  { %4789 = vmatpush.bf16.msra.mxu2 %v7484_v11  ;;  %4758 = vmatmul.bf16.vlgmr.msrb.gmra.mxu3 %v118_v16  ;;  %v7514_v11 = vld [vmem:[%s9467_s1 + $0xba8] sm:$0xff]  ;;  %v7505_v16 = vld [vmem:[%s9467_s1 + $0xb60] sm:$0xff] }
 0x145   :  { %4802 = vmatpush.bf16.msra.mxu3 %v7492_v12  ;;  %v7522_v12 = vld [vmem:[%s9467_s1 + $0xbe8] sm:$0xff] }
 0x146   :  { %4764 = vmatpush.bf16.msra.mxu0 %v7467_v17  ;;  %v4538_v37 = vpop.f32.mrf.mxu2  ;;  %v4514_v40 = vpop.f32.mrf.mxu0 }
 0x147   :  { %4777 = vmatpush.bf16.msra.mxu1 %v7475_v18  ;;  %v4539_v38 = vadd.f32 %v4538_v37, %v4526_v32  ;;  %v4551_v39 = vpop.f32.mrf.mxu3  ;;  %v4527_v44 = vpop.f32.mrf.mxu1  ;;  %v7513_v18 = vld [vmem:[%s9467_s1 + $0xba0] sm:$0xff]  ;;  %v7510_v37 = vld [vmem:[%s9467_s1 + $0xb88] sm:$0xff] }
 0x148   :  { %4790 = vmatpush.bf16.msra.mxu2 %v7483_v19  ;;  %v7521_v19 = vld [vmem:[%s9467_s1 + $0xbe0] sm:$0xff] }
 0x149   :  { %4803 = vmatpush.bf16.msra.mxu3 %v7491_v20  ;;  %v8860_v41 = vadd.f32 %v4551_v39, %v4539_v38  ;;  %v7518_v38 = vld [vmem:[%s9467_s1 + $0xbc8] sm:$0xff]  ;;  %v7517_v44 = vld [vmem:[%s9467_s1 + $0xbc0] sm:$0xff] }
 0x14a   :  { %4765 = vmatpush.bf16.msra.mxu0 %v7466_v21  ;;  %v7496_v21 = vld [vmem:[%s9467_s1 + $0xb18] sm:$0xff] }
 0x14b   :  { %4778 = vmatpush.bf16.msra.mxu1 %v7474_v22  ;;  %v7504_v22 = vld [vmem:[%s9467_s1 + $0xb58] sm:$0xff] }
 0x14c   :  { %4791 = vmatpush.bf16.msra.mxu2 %v7482_v23  ;;  %v7512_v23 = vld [vmem:[%s9467_s1 + $0xb98] sm:$0xff] }
 0x14d   :  { %4804 = vmatpush.bf16.msra.mxu3 %v7490_v24  ;;  %v7520_v24 = vld [vmem:[%s9467_s1 + $0xbd8] sm:$0xff] }
 0x14e   :  { %4766 = vmatpush.bf16.msra.mxu0 %v7465_v27  ;;  %v4540_v51 = vpop.f32.mrf.mxu2 }
 0x14f   :  { %4779 = vmatpush.bf16.msra.mxu1 %v7473_v28  ;;  %v4553_v52 = vpop.f32.mrf.mxu3  ;;  %v7548_v51 = vld [vmem:[%s9467_s1 + $0xcb8] sm:$0xff] }
 0x150   :  { %4792 = vmatpush.bf16.msra.mxu2 %v7481_v30  ;;  %v7495_v30 = vld [vmem:[%s9467_s1 + $0xb10] sm:$0xff]  ;;  %v7556_v52 = vld [vmem:[%s9467_s1 + $0xcf8] sm:$0xff] }
 0x151   :  { %4805 = vmatpush.bf16.msra.mxu3 %v7489_v31  ;;  %v7503_v31 = vld [vmem:[%s9467_s1 + $0xb50] sm:$0xff] }
 0x152   :  { %4767 = vmatpush.bf16.msra.mxu0 %v7464_v33  ;;  %v7511_v33 = vld [vmem:[%s9467_s1 + $0xb90] sm:$0xff] }
 0x153   :  { %4780 = vmatpush.bf16.msra.mxu1 %v7472_v34  ;;  %v7519_v34 = vld [vmem:[%s9467_s1 + $0xbd0] sm:$0xff] }
 0x154   :  { %4793 = vmatpush.bf16.msra.mxu2 %v7480_v35  ;;  %v7494_v35 = vld [vmem:[%s9467_s1 + $0xb08] sm:$0xff] }
 0x155   :  { %4806 = vmatpush.bf16.msra.mxu3 %v7488_v36  ;;  %v7502_v36 = vld [vmem:[%s9467_s1 + $0xb48] sm:$0xff] }
 0x156   :  { %4768 = vmatpush.bf16.msra.mxu0 %v7463_v42  ;;  %v7501_v42 = vld [vmem:[%s9467_s1 + $0xb40] sm:$0xff] }
 0x157   :  { %4781 = vmatpush.bf16.msra.mxu1 %v7471_v43  ;;  %v7509_v43 = vld [vmem:[%s9467_s1 + $0xb80] sm:$0xff] }
 0x158   :  { %4794 = vmatpush.bf16.msra.mxu2 %v7479_v45  ;;  %v7532_v45 = vld [vmem:[%s9467_s1 + $0xc38] sm:$0xff] }
 0x159   :  { %4807 = vmatpush.bf16.msra.mxu3 %v7487_v46  ;;  %v59_v46 = vld [vmem:[%s9466_s0 + $0x160] sm:$0xff] }
 0x15a   :  { %4769 = vmatpush.bf16.msra.mxu0 %v7462_v47  ;;  %v61_v47 = vld [vmem:[%s9466_s0 + $0x170] sm:$0xff] }
 0x15b   :  { %4782 = vmatpush.bf16.msra.mxu1 %v7470_v48  ;;  %v7540_v48 = vld [vmem:[%s9467_s1 + $0xc78] sm:$0xff] }
 0x15c   :  { %4795 = vmatpush.bf16.msra.mxu2 %v7478_v49  ;;  %v60_v49 = vld [vmem:[%s9466_s0 + $0x168] sm:$0xff] }
 0x15d   :  { %4808 = vmatpush.bf16.msra.mxu3 %v7486_v50  ;;  %v62_v50 = vld [vmem:[%s9466_s0 + $0x178] sm:$0xff] }
 0x15e   :  { %4770 = vmatpush.bf16.msra.mxu0 %v7461_v53  ;;  %v4564_v13 = vpop.f32.mrf.mxu0  ;;  %v123_v53 = vpack.c.bf16 %v59_v46, %v59_v46  ;;  %v7571_v46 = vld [vmem:[%s9467_s1 + $0xd70] sm:$0xff] }
 0x15f   :  { %4783 = vmatpush.bf16.msra.mxu1 %v7469_v54  ;;  %v4565_v14 = vadd.f32 %v4564_v13, %v8860_v41  ;;  %v4577_v17 = vpop.f32.mrf.mxu1  ;;  %v7493_v41 = vld [vmem:[%s9467_s1 + $0xb00] sm:$0xff]  ;;  %v125_v54 = vpack.c.bf16 %v61_v47, %v61_v47  ;;  %v7579_v47 = vld [vmem:[%s9467_s1 + $0xdb0] sm:$0xff] }
 0x160   :  { %4796 = vmatpush.bf16.msra.mxu2 %v7477_v55  ;;  %v124_v55 = vpack.c.bf16 %v60_v49, %v60_v49  ;;  %v7562_v49 = vld [vmem:[%s9467_s1 + $0xd28] sm:$0xff] }
 0x161   :  { %4809 = vmatpush.bf16.msra.mxu3 %v7485_v56  ;;  %4771 = vmatmul.bf16.vlgmr.msra.gmra.mxu0 %v119_v1  ;;  %v4578_v20 = vadd.f32 %v4577_v17, %v4565_v14  ;;  %v126_v56 = vpack.c.bf16 %v62_v50, %v62_v50  ;;  %v7570_v50 = vld [vmem:[%s9467_s1 + $0xd68] sm:$0xff] }
 0x162   :  { %4815 = vmatpush.bf16.msrb.mxu0 %v7500_v57  ;;  %4784 = vmatmul.bf16.vlgmr.msra.gmra.mxu1 %v120_v3  ;;  %v7531_v57 = vld [vmem:[%s9467_s1 + $0xc30] sm:$0xff]  ;;  %v7529_v3 = vld [vmem:[%s9467_s1 + $0xc20] sm:$0xff] }
 0x163   :  { %4828 = vmatpush.bf16.msrb.mxu1 %v7508_v60  ;;  %4797 = vmatmul.bf16.vlgmr.msra.gmra.mxu2 %v121_v2  ;;  %v7555_v60 = vld [vmem:[%s9467_s1 + $0xcf0] sm:$0xff] }
 0x164   :  { %4841 = vmatpush.bf16.msrb.mxu2 %v7516_v63  ;;  %4810 = vmatmul.bf16.vlgmr.msra.gmra.mxu3 %v122_v4  ;;  %v7546_v63 = vld [vmem:[%s9467_s1 + $0xca8] sm:$0xff]  ;;  %v7537_v4 = vld [vmem:[%s9467_s1 + $0xc60] sm:$0xff] }
 0x165   :  { %4854 = vmatpush.bf16.msrb.mxu3 %v7524_v0  ;;  %v7554_v0 = vld [vmem:[%s9467_s1 + $0xce8] sm:$0xff] }
 0x166   :  { %4816 = vmatpush.bf16.msrb.mxu0 %v7499_v5  ;;  %v4590_v25 = vpop.f32.mrf.mxu2  ;;  %v4566_v28 = vpop.f32.mrf.mxu0 }
 0x167   :  { %4829 = vmatpush.bf16.msrb.mxu1 %v7507_v6  ;;  %v4591_v26 = vadd.f32 %v4590_v25, %v4578_v20  ;;  %v4603_v27 = vpop.f32.mrf.mxu3  ;;  %v4579_v32 = vpop.f32.mrf.mxu1  ;;  %v7545_v6 = vld [vmem:[%s9467_s1 + $0xca0] sm:$0xff]  ;;  %v7542_v25 = vld [vmem:[%s9467_s1 + $0xc88] sm:$0xff] }
 0x168   :  { %4842 = vmatpush.bf16.msrb.mxu2 %v7515_v7  ;;  %v7553_v7 = vld [vmem:[%s9467_s1 + $0xce0] sm:$0xff] }
 0x169   :  { %4855 = vmatpush.bf16.msrb.mxu3 %v7523_v8  ;;  %v8971_v29 = vadd.f32 %v4603_v27, %v4591_v26  ;;  %v7550_v26 = vld [vmem:[%s9467_s1 + $0xcc8] sm:$0xff]  ;;  %v7549_v32 = vld [vmem:[%s9467_s1 + $0xcc0] sm:$0xff] }
 0x16a   :  { %4817 = vmatpush.bf16.msrb.mxu0 %v7498_v9  ;;  %v7528_v9 = vld [vmem:[%s9467_s1 + $0xc18] sm:$0xff] }
 0x16b   :  { %4830 = vmatpush.bf16.msrb.mxu1 %v7506_v10  ;;  %v7536_v10 = vld [vmem:[%s9467_s1 + $0xc58] sm:$0xff] }
 0x16c   :  { %4843 = vmatpush.bf16.msrb.mxu2 %v7514_v11  ;;  %v7544_v11 = vld [vmem:[%s9467_s1 + $0xc98] sm:$0xff] }
 0x16d   :  { %4856 = vmatpush.bf16.msrb.mxu3 %v7522_v12  ;;  %v7552_v12 = vld [vmem:[%s9467_s1 + $0xcd8] sm:$0xff] }
 0x16e   :  { %4818 = vmatpush.bf16.msrb.mxu0 %v7497_v15  ;;  %v4592_v39 = vpop.f32.mrf.mxu2 }
 0x16f   :  { %4831 = vmatpush.bf16.msrb.mxu1 %v7505_v16  ;;  %v4605_v40 = vpop.f32.mrf.mxu3  ;;  %v7580_v39 = vld [vmem:[%s9467_s1 + $0xdb8] sm:$0xff] }
 0x170   :  { %4844 = vmatpush.bf16.msrb.mxu2 %v7513_v18  ;;  %v7527_v18 = vld [vmem:[%s9467_s1 + $0xc10] sm:$0xff]  ;;  %v7588_v40 = vld [vmem:[%s9467_s1 + $0xdf8] sm:$0xff] }
 0x171   :  { %4857 = vmatpush.bf16.msrb.mxu3 %v7521_v19  ;;  %v7535_v19 = vld [vmem:[%s9467_s1 + $0xc50] sm:$0xff] }
 0x172   :  { %4819 = vmatpush.bf16.msrb.mxu0 %v7496_v21  ;;  %v7543_v21 = vld [vmem:[%s9467_s1 + $0xc90] sm:$0xff] }
 0x173   :  { %4832 = vmatpush.bf16.msrb.mxu1 %v7504_v22  ;;  %v7551_v22 = vld [vmem:[%s9467_s1 + $0xcd0] sm:$0xff] }
 0x174   :  { %4845 = vmatpush.bf16.msrb.mxu2 %v7512_v23  ;;  %v7526_v23 = vld [vmem:[%s9467_s1 + $0xc08] sm:$0xff] }
 0x175   :  { %4858 = vmatpush.bf16.msrb.mxu3 %v7520_v24  ;;  %v7534_v24 = vld [vmem:[%s9467_s1 + $0xc48] sm:$0xff] }
 0x176   :  { %4820 = vmatpush.bf16.msrb.mxu0 %v7495_v30  ;;  %v7533_v30 = vld [vmem:[%s9467_s1 + $0xc40] sm:$0xff] }
 0x177   :  { %4833 = vmatpush.bf16.msrb.mxu1 %v7503_v31  ;;  %v7541_v31 = vld [vmem:[%s9467_s1 + $0xc80] sm:$0xff] }
 0x178   :  { %4846 = vmatpush.bf16.msrb.mxu2 %v7511_v33  ;;  %v7564_v33 = vld [vmem:[%s9467_s1 + $0xd38] sm:$0xff] }
 0x179   :  { %4859 = vmatpush.bf16.msrb.mxu3 %v7519_v34  ;;  %v63_v34 = vld [vmem:[%s9466_s0 + $0x180] sm:$0xff] }
 0x17a   :  { %4821 = vmatpush.bf16.msrb.mxu0 %v7494_v35  ;;  %v65_v35 = vld [vmem:[%s9466_s0 + $0x190] sm:$0xff] }
 0x17b   :  { %4834 = vmatpush.bf16.msrb.mxu1 %v7502_v36  ;;  %v7572_v36 = vld [vmem:[%s9467_s1 + $0xd78] sm:$0xff] }
 0x17c   :  { %4847 = vmatpush.bf16.msrb.mxu2 %v7510_v37  ;;  %v64_v37 = vld [vmem:[%s9466_s0 + $0x188] sm:$0xff] }
 0x17d   :  { %4860 = vmatpush.bf16.msrb.mxu3 %v7518_v38  ;;  %v66_v38 = vld [vmem:[%s9466_s0 + $0x198] sm:$0xff] }
 0x17e   :  { %4822 = vmatpush.bf16.msrb.mxu0 %v7493_v41  ;;  %v4616_v1 = vpop.f32.mrf.mxu0  ;;  %v127_v41 = vpack.c.bf16 %v63_v34, %v63_v34  ;;  %v7603_v34 = vld [vmem:[%s9467_s1 + $0xe70] sm:$0xff] }
 0x17f   :  { %4835 = vmatpush.bf16.msrb.mxu1 %v7501_v42  ;;  %v4617_v2 = vadd.f32 %v4616_v1, %v8971_v29  ;;  %v4629_v5 = vpop.f32.mrf.mxu1  ;;  %v7525_v29 = vld [vmem:[%s9467_s1 + $0xc00] sm:$0xff]  ;;  %v129_v42 = vpack.c.bf16 %v65_v35, %v65_v35  ;;  %v7611_v35 = vld [vmem:[%s9467_s1 + $0xeb0] sm:$0xff] }
 0x180   :  { %4848 = vmatpush.bf16.msrb.mxu2 %v7509_v43  ;;  %v128_v43 = vpack.c.bf16 %v64_v37, %v64_v37  ;;  %v7594_v37 = vld [vmem:[%s9467_s1 + $0xe28] sm:$0xff] }
 0x181   :  { %4861 = vmatpush.bf16.msrb.mxu3 %v7517_v44  ;;  %4823 = vmatmul.bf16.vlgmr.msrb.gmra.mxu0 %v123_v53  ;;  %v4630_v8 = vadd.f32 %v4629_v5, %v4617_v2  ;;  %v130_v44 = vpack.c.bf16 %v66_v38, %v66_v38  ;;  %v7602_v38 = vld [vmem:[%s9467_s1 + $0xe68] sm:$0xff] }
 0x182   :  { %4867 = vmatpush.bf16.msra.mxu0 %v7532_v45  ;;  %4836 = vmatmul.bf16.vlgmr.msrb.gmra.mxu1 %v124_v55  ;;  %v7563_v45 = vld [vmem:[%s9467_s1 + $0xd30] sm:$0xff]  ;;  %v7561_v55 = vld [vmem:[%s9467_s1 + $0xd20] sm:$0xff] }
 0x183   :  { %4880 = vmatpush.bf16.msra.mxu1 %v7540_v48  ;;  %4849 = vmatmul.bf16.vlgmr.msrb.gmra.mxu2 %v125_v54  ;;  %v7587_v48 = vld [vmem:[%s9467_s1 + $0xdf0] sm:$0xff] }
 0x184   :  { %4893 = vmatpush.bf16.msra.mxu2 %v7548_v51  ;;  %4862 = vmatmul.bf16.vlgmr.msrb.gmra.mxu3 %v126_v56  ;;  %v7578_v51 = vld [vmem:[%s9467_s1 + $0xda8] sm:$0xff]  ;;  %v7569_v56 = vld [vmem:[%s9467_s1 + $0xd60] sm:$0xff] }
 0x185   :  { %4906 = vmatpush.bf16.msra.mxu3 %v7556_v52  ;;  %v7586_v52 = vld [vmem:[%s9467_s1 + $0xde8] sm:$0xff] }
 0x186   :  { %4868 = vmatpush.bf16.msra.mxu0 %v7531_v57  ;;  %v4642_v13 = vpop.f32.mrf.mxu2  ;;  %v4618_v16 = vpop.f32.mrf.mxu0 }
 0x187   :  { %4881 = vmatpush.bf16.msra.mxu1 %v7539_v58  ;;  %v4643_v14 = vadd.f32 %v4642_v13, %v4630_v8  ;;  %v4655_v15 = vpop.f32.mrf.mxu3  ;;  %v4631_v20 = vpop.f32.mrf.mxu1  ;;  %v7577_v58 = vld [vmem:[%s9467_s1 + $0xda0] sm:$0xff]  ;;  %v7574_v13 = vld [vmem:[%s9467_s1 + $0xd88] sm:$0xff] }
 0x188   :  { %4894 = vmatpush.bf16.msra.mxu2 %v7547_v59  ;;  %v7585_v59 = vld [vmem:[%s9467_s1 + $0xde0] sm:$0xff] }
 0x189   :  { %4907 = vmatpush.bf16.msra.mxu3 %v7555_v60  ;;  %v9082_v17 = vadd.f32 %v4655_v15, %v4643_v14  ;;  %v7582_v14 = vld [vmem:[%s9467_s1 + $0xdc8] sm:$0xff]  ;;  %v7581_v20 = vld [vmem:[%s9467_s1 + $0xdc0] sm:$0xff] }
 0x18a   :  { %4869 = vmatpush.bf16.msra.mxu0 %v7530_v61  ;;  %v7560_v61 = vld [vmem:[%s9467_s1 + $0xd18] sm:$0xff] }
 0x18b   :  { %4882 = vmatpush.bf16.msra.mxu1 %v7538_v62  ;;  %v7568_v62 = vld [vmem:[%s9467_s1 + $0xd58] sm:$0xff] }
 0x18c   :  { %4895 = vmatpush.bf16.msra.mxu2 %v7546_v63  ;;  %v7576_v63 = vld [vmem:[%s9467_s1 + $0xd98] sm:$0xff] }
 0x18d   :  { %4908 = vmatpush.bf16.msra.mxu3 %v7554_v0  ;;  %v7584_v0 = vld [vmem:[%s9467_s1 + $0xdd8] sm:$0xff] }
 0x18e   :  { %4870 = vmatpush.bf16.msra.mxu0 %v7529_v3  ;;  %v4644_v27 = vpop.f32.mrf.mxu2 }
 0x18f   :  { %4883 = vmatpush.bf16.msra.mxu1 %v7537_v4  ;;  %v4657_v28 = vpop.f32.mrf.mxu3  ;;  %v7612_v27 = vld [vmem:[%s9467_s1 + $0xeb8] sm:$0xff] }
 0x190   :  { %4896 = vmatpush.bf16.msra.mxu2 %v7545_v6  ;;  %v7559_v6 = vld [vmem:[%s9467_s1 + $0xd10] sm:$0xff]  ;;  %v7620_v28 = vld [vmem:[%s9467_s1 + $0xef8] sm:$0xff] }
 0x191   :  { %4909 = vmatpush.bf16.msra.mxu3 %v7553_v7  ;;  %v7567_v7 = vld [vmem:[%s9467_s1 + $0xd50] sm:$0xff] }
 0x192   :  { %4871 = vmatpush.bf16.msra.mxu0 %v7528_v9  ;;  %v7575_v9 = vld [vmem:[%s9467_s1 + $0xd90] sm:$0xff] }
 0x193   :  { %4884 = vmatpush.bf16.msra.mxu1 %v7536_v10  ;;  %v7583_v10 = vld [vmem:[%s9467_s1 + $0xdd0] sm:$0xff] }
 0x194   :  { %4897 = vmatpush.bf16.msra.mxu2 %v7544_v11  ;;  %v7558_v11 = vld [vmem:[%s9467_s1 + $0xd08] sm:$0xff] }
 0x195   :  { %4910 = vmatpush.bf16.msra.mxu3 %v7552_v12  ;;  %v7566_v12 = vld [vmem:[%s9467_s1 + $0xd48] sm:$0xff] }
 0x196   :  { %4872 = vmatpush.bf16.msra.mxu0 %v7527_v18  ;;  %v7565_v18 = vld [vmem:[%s9467_s1 + $0xd40] sm:$0xff] }
 0x197   :  { %4885 = vmatpush.bf16.msra.mxu1 %v7535_v19  ;;  %v7573_v19 = vld [vmem:[%s9467_s1 + $0xd80] sm:$0xff] }
 0x198   :  { %4898 = vmatpush.bf16.msra.mxu2 %v7543_v21  ;;  %v7596_v21 = vld [vmem:[%s9467_s1 + $0xe38] sm:$0xff] }
 0x199   :  { %4911 = vmatpush.bf16.msra.mxu3 %v7551_v22  ;;  %v67_v22 = vld [vmem:[%s9466_s0 + $0x1a0] sm:$0xff] }
 0x19a   :  { %4873 = vmatpush.bf16.msra.mxu0 %v7526_v23  ;;  %v69_v23 = vld [vmem:[%s9466_s0 + $0x1b0] sm:$0xff] }
 0x19b   :  { %4886 = vmatpush.bf16.msra.mxu1 %v7534_v24  ;;  %v7604_v24 = vld [vmem:[%s9467_s1 + $0xe78] sm:$0xff] }
 0x19c   :  { %4899 = vmatpush.bf16.msra.mxu2 %v7542_v25  ;;  %v68_v25 = vld [vmem:[%s9466_s0 + $0x1a8] sm:$0xff] }
 0x19d   :  { %4912 = vmatpush.bf16.msra.mxu3 %v7550_v26  ;;  %v70_v26 = vld [vmem:[%s9466_s0 + $0x1b8] sm:$0xff] }
 0x19e   :  { %4874 = vmatpush.bf16.msra.mxu0 %v7525_v29  ;;  %v4668_v53 = vpop.f32.mrf.mxu0  ;;  %v131_v29 = vpack.c.bf16 %v67_v22, %v67_v22  ;;  %v7635_v22 = vld [vmem:[%s9467_s1 + $0xf70] sm:$0xff] }
 0x19f   :  { %4887 = vmatpush.bf16.msra.mxu1 %v7533_v30  ;;  %v4669_v54 = vadd.f32 %v4668_v53, %v9082_v17  ;;  %v4681_v57 = vpop.f32.mrf.mxu1  ;;  %v7557_v17 = vld [vmem:[%s9467_s1 + $0xd00] sm:$0xff]  ;;  %v133_v30 = vpack.c.bf16 %v69_v23, %v69_v23  ;;  %v7643_v23 = vld [vmem:[%s9467_s1 + $0xfb0] sm:$0xff] }
 0x1a0   :  { %4900 = vmatpush.bf16.msra.mxu2 %v7541_v31  ;;  %v132_v31 = vpack.c.bf16 %v68_v25, %v68_v25  ;;  %v7626_v25 = vld [vmem:[%s9467_s1 + $0xf28] sm:$0xff] }
 0x1a1   :  { %4913 = vmatpush.bf16.msra.mxu3 %v7549_v32  ;;  %4875 = vmatmul.bf16.vlgmr.msra.gmra.mxu0 %v127_v41  ;;  %v4682_v60 = vadd.f32 %v4681_v57, %v4669_v54  ;;  %v134_v32 = vpack.c.bf16 %v70_v26, %v70_v26  ;;  %v7634_v26 = vld [vmem:[%s9467_s1 + $0xf68] sm:$0xff] }
 0x1a2   :  { %4919 = vmatpush.bf16.msrb.mxu0 %v7564_v33  ;;  %4888 = vmatmul.bf16.vlgmr.msra.gmra.mxu1 %v128_v43  ;;  %v7595_v33 = vld [vmem:[%s9467_s1 + $0xe30] sm:$0xff]  ;;  %v7593_v43 = vld [vmem:[%s9467_s1 + $0xe20] sm:$0xff] }
 0x1a3   :  { %4932 = vmatpush.bf16.msrb.mxu1 %v7572_v36  ;;  %4901 = vmatmul.bf16.vlgmr.msra.gmra.mxu2 %v129_v42  ;;  %v7619_v36 = vld [vmem:[%s9467_s1 + $0xef0] sm:$0xff] }
 0x1a4   :  { %4945 = vmatpush.bf16.msrb.mxu2 %v7580_v39  ;;  %4914 = vmatmul.bf16.vlgmr.msra.gmra.mxu3 %v130_v44  ;;  %v7610_v39 = vld [vmem:[%s9467_s1 + $0xea8] sm:$0xff]  ;;  %v7601_v44 = vld [vmem:[%s9467_s1 + $0xe60] sm:$0xff] }
 0x1a5   :  { %4958 = vmatpush.bf16.msrb.mxu3 %v7588_v40  ;;  %v7618_v40 = vld [vmem:[%s9467_s1 + $0xee8] sm:$0xff] }
 0x1a6   :  { %4920 = vmatpush.bf16.msrb.mxu0 %v7563_v45  ;;  %v4694_v1 = vpop.f32.mrf.mxu2  ;;  %v4670_v4 = vpop.f32.mrf.mxu0 }
 0x1a7   :  { %4933 = vmatpush.bf16.msrb.mxu1 %v7571_v46  ;;  %v4695_v2 = vadd.f32 %v4694_v1, %v4682_v60  ;;  %v4707_v3 = vpop.f32.mrf.mxu3  ;;  %v4683_v8 = vpop.f32.mrf.mxu1  ;;  %v7609_v46 = vld [vmem:[%s9467_s1 + $0xea0] sm:$0xff]  ;;  %v7606_v1 = vld [vmem:[%s9467_s1 + $0xe88] sm:$0xff] }
 0x1a8   :  { %4946 = vmatpush.bf16.msrb.mxu2 %v7579_v47  ;;  %v7617_v47 = vld [vmem:[%s9467_s1 + $0xee0] sm:$0xff] }
 0x1a9   :  { %4959 = vmatpush.bf16.msrb.mxu3 %v7587_v48  ;;  %v9193_v5 = vadd.f32 %v4707_v3, %v4695_v2  ;;  %v7614_v2 = vld [vmem:[%s9467_s1 + $0xec8] sm:$0xff]  ;;  %v7613_v8 = vld [vmem:[%s9467_s1 + $0xec0] sm:$0xff] }
 0x1aa   :  { %4921 = vmatpush.bf16.msrb.mxu0 %v7562_v49  ;;  %v7592_v49 = vld [vmem:[%s9467_s1 + $0xe18] sm:$0xff] }
 0x1ab   :  { %4934 = vmatpush.bf16.msrb.mxu1 %v7570_v50  ;;  %v7600_v50 = vld [vmem:[%s9467_s1 + $0xe58] sm:$0xff] }
 0x1ac   :  { %4947 = vmatpush.bf16.msrb.mxu2 %v7578_v51  ;;  %v7608_v51 = vld [vmem:[%s9467_s1 + $0xe98] sm:$0xff] }
 0x1ad   :  { %4960 = vmatpush.bf16.msrb.mxu3 %v7586_v52  ;;  %v7616_v52 = vld [vmem:[%s9467_s1 + $0xed8] sm:$0xff] }
 0x1ae   :  { %4922 = vmatpush.bf16.msrb.mxu0 %v7561_v55  ;;  %v4696_v15 = vpop.f32.mrf.mxu2 }
 0x1af   :  { %4935 = vmatpush.bf16.msrb.mxu1 %v7569_v56  ;;  %v4709_v16 = vpop.f32.mrf.mxu3  ;;  %v7644_v15 = vld [vmem:[%s9467_s1 + $0xfb8] sm:$0xff] }
 0x1b0   :  { %4948 = vmatpush.bf16.msrb.mxu2 %v7577_v58  ;;  %v7591_v58 = vld [vmem:[%s9467_s1 + $0xe10] sm:$0xff]  ;;  %v7652_v16 = vld [vmem:[%s9467_s1 + $0xff8] sm:$0xff] }
 0x1b1   :  { %4961 = vmatpush.bf16.msrb.mxu3 %v7585_v59  ;;  %v7599_v59 = vld [vmem:[%s9467_s1 + $0xe50] sm:$0xff] }
 0x1b2   :  { %4923 = vmatpush.bf16.msrb.mxu0 %v7560_v61  ;;  %v7607_v61 = vld [vmem:[%s9467_s1 + $0xe90] sm:$0xff] }
 0x1b3   :  { %4936 = vmatpush.bf16.msrb.mxu1 %v7568_v62  ;;  %v7615_v62 = vld [vmem:[%s9467_s1 + $0xed0] sm:$0xff] }
 0x1b4   :  { %4949 = vmatpush.bf16.msrb.mxu2 %v7576_v63  ;;  %v7590_v63 = vld [vmem:[%s9467_s1 + $0xe08] sm:$0xff] }
 0x1b5   :  { %4962 = vmatpush.bf16.msrb.mxu3 %v7584_v0  ;;  %v7598_v0 = vld [vmem:[%s9467_s1 + $0xe48] sm:$0xff] }
 0x1b6   :  { %4924 = vmatpush.bf16.msrb.mxu0 %v7559_v6  ;;  %v7597_v6 = vld [vmem:[%s9467_s1 + $0xe40] sm:$0xff] }
 0x1b7   :  { %4937 = vmatpush.bf16.msrb.mxu1 %v7567_v7  ;;  %v7605_v7 = vld [vmem:[%s9467_s1 + $0xe80] sm:$0xff] }
 0x1b8   :  { %4950 = vmatpush.bf16.msrb.mxu2 %v7575_v9  ;;  %v7628_v9 = vld [vmem:[%s9467_s1 + $0xf38] sm:$0xff] }
 0x1b9   :  { %4963 = vmatpush.bf16.msrb.mxu3 %v7583_v10  ;;  %v71_v10 = vld [vmem:[%s9466_s0 + $0x1c0] sm:$0xff] }
 0x1ba   :  { %4925 = vmatpush.bf16.msrb.mxu0 %v7558_v11  ;;  %v73_v11 = vld [vmem:[%s9466_s0 + $0x1d0] sm:$0xff] }
 0x1bb   :  { %4938 = vmatpush.bf16.msrb.mxu1 %v7566_v12  ;;  %v7636_v12 = vld [vmem:[%s9467_s1 + $0xf78] sm:$0xff] }
 0x1bc   :  { %4951 = vmatpush.bf16.msrb.mxu2 %v7574_v13  ;;  %v72_v13 = vld [vmem:[%s9466_s0 + $0x1c8] sm:$0xff] }
 0x1bd   :  { %4964 = vmatpush.bf16.msrb.mxu3 %v7582_v14  ;;  %v74_v14 = vld [vmem:[%s9466_s0 + $0x1d8] sm:$0xff] }
 0x1be   :  { %4926 = vmatpush.bf16.msrb.mxu0 %v7557_v17  ;;  %v4720_v41 = vpop.f32.mrf.mxu0  ;;  %v135_v17 = vpack.c.bf16 %v71_v10, %v71_v10 }
 0x1bf   :  { %4939 = vmatpush.bf16.msrb.mxu1 %v7565_v18  ;;  %v4721_v42 = vadd.f32 %v4720_v41, %v9193_v5  ;;  %v4733_v45 = vpop.f32.mrf.mxu1  ;;  %v7589_v5 = vld [vmem:[%s9467_s1 + $0xe00] sm:$0xff]  ;;  %v137_v18 = vpack.c.bf16 %v73_v11, %v73_v11 }
 0x1c0   :  { %4952 = vmatpush.bf16.msrb.mxu2 %v7573_v19  ;;  %v136_v19 = vpack.c.bf16 %v72_v13, %v72_v13 }
 0x1c1   :  { %4965 = vmatpush.bf16.msrb.mxu3 %v7581_v20  ;;  %4927 = vmatmul.bf16.vlgmr.msrb.gmra.mxu0 %v131_v29  ;;  %v4734_v48 = vadd.f32 %v4733_v45, %v4721_v42  ;;  %v138_v20 = vpack.c.bf16 %v74_v14, %v74_v14 }
 0x1c2   :  { %4971 = vmatpush.bf16.msra.mxu0 %v7596_v21  ;;  %4940 = vmatmul.bf16.vlgmr.msrb.gmra.mxu1 %v132_v31  ;;  %v7627_v21 = vld [vmem:[%s9467_s1 + $0xf30] sm:$0xff]  ;;  %v7625_v31 = vld [vmem:[%s9467_s1 + $0xf20] sm:$0xff] }
 0x1c3   :  { %4984 = vmatpush.bf16.msra.mxu1 %v7604_v24  ;;  %4953 = vmatmul.bf16.vlgmr.msrb.gmra.mxu2 %v133_v30  ;;  %v7651_v24 = vld [vmem:[%s9467_s1 + $0xff0] sm:$0xff] }
 0x1c4   :  { %4997 = vmatpush.bf16.msra.mxu2 %v7612_v27  ;;  %4966 = vmatmul.bf16.vlgmr.msrb.gmra.mxu3 %v134_v32  ;;  %v7642_v27 = vld [vmem:[%s9467_s1 + $0xfa8] sm:$0xff]  ;;  %v7633_v32 = vld [vmem:[%s9467_s1 + $0xf60] sm:$0xff] }
 0x1c5   :  { %5010 = vmatpush.bf16.msra.mxu3 %v7620_v28  ;;  %v7650_v28 = vld [vmem:[%s9467_s1 + $0xfe8] sm:$0xff] }
 0x1c6   :  { %4972 = vmatpush.bf16.msra.mxu0 %v7595_v33  ;;  %v4746_v53 = vpop.f32.mrf.mxu2  ;;  %v4722_v56 = vpop.f32.mrf.mxu0 }
 0x1c7   :  { %4985 = vmatpush.bf16.msra.mxu1 %v7603_v34  ;;  %v4747_v54 = vadd.f32 %v4746_v53, %v4734_v48  ;;  %v4759_v55 = vpop.f32.mrf.mxu3  ;;  %v4735_v60 = vpop.f32.mrf.mxu1  ;;  %v7641_v34 = vld [vmem:[%s9467_s1 + $0xfa0] sm:$0xff]  ;;  %v7638_v53 = vld [vmem:[%s9467_s1 + $0xf88] sm:$0xff] }
 0x1c8   :  { %4998 = vmatpush.bf16.msra.mxu2 %v7611_v35  ;;  %v7649_v35 = vld [vmem:[%s9467_s1 + $0xfe0] sm:$0xff] }
 0x1c9   :  { %5011 = vmatpush.bf16.msra.mxu3 %v7619_v36  ;;  %v9304_v57 = vadd.f32 %v4759_v55, %v4747_v54  ;;  %v7646_v54 = vld [vmem:[%s9467_s1 + $0xfc8] sm:$0xff]  ;;  %v75_v60 = vld [vmem:[%s9466_s0 + $0x1e0] sm:$0xff] }
 0x1ca   :  { %4973 = vmatpush.bf16.msra.mxu0 %v7594_v37  ;;  %v7624_v37 = vld [vmem:[%s9467_s1 + $0xf18] sm:$0xff] }
 0x1cb   :  { %4986 = vmatpush.bf16.msra.mxu1 %v7602_v38  ;;  %v7632_v38 = vld [vmem:[%s9467_s1 + $0xf58] sm:$0xff] }
 0x1cc   :  { %4999 = vmatpush.bf16.msra.mxu2 %v7610_v39  ;;  %v7640_v39 = vld [vmem:[%s9467_s1 + $0xf98] sm:$0xff] }
 0x1cd   :  { %5012 = vmatpush.bf16.msra.mxu3 %v7618_v40  ;;  %v7648_v40 = vld [vmem:[%s9467_s1 + $0xfd8] sm:$0xff] }
 0x1ce   :  { %4974 = vmatpush.bf16.msra.mxu0 %v7593_v43  ;;  %v4748_v3 = vpop.f32.mrf.mxu2 }
 0x1cf   :  { %4987 = vmatpush.bf16.msra.mxu1 %v7601_v44  ;;  %v4761_v4 = vpop.f32.mrf.mxu3 }
 0x1d0   :  { %5000 = vmatpush.bf16.msra.mxu2 %v7609_v46  ;;  %v7623_v46 = vld [vmem:[%s9467_s1 + $0xf10] sm:$0xff] }
 0x1d1   :  { %5013 = vmatpush.bf16.msra.mxu3 %v7617_v47  ;;  %v7631_v47 = vld [vmem:[%s9467_s1 + $0xf50] sm:$0xff] }
 0x1d2   :  { %4975 = vmatpush.bf16.msra.mxu0 %v7592_v49  ;;  %v7639_v49 = vld [vmem:[%s9467_s1 + $0xf90] sm:$0xff] }
 0x1d3   :  { %4988 = vmatpush.bf16.msra.mxu1 %v7600_v50  ;;  %v7647_v50 = vld [vmem:[%s9467_s1 + $0xfd0] sm:$0xff] }
 0x1d4   :  { %5001 = vmatpush.bf16.msra.mxu2 %v7608_v51  ;;  %v7622_v51 = vld [vmem:[%s9467_s1 + $0xf08] sm:$0xff] }
 0x1d5   :  { %5014 = vmatpush.bf16.msra.mxu3 %v7616_v52  ;;  %v7630_v52 = vld [vmem:[%s9467_s1 + $0xf48] sm:$0xff] }
 0x1d6   :  { %4976 = vmatpush.bf16.msra.mxu0 %v7591_v58  ;;  %v7629_v58 = vld [vmem:[%s9467_s1 + $0xf40] sm:$0xff] }
 0x1d7   :  { %4989 = vmatpush.bf16.msra.mxu1 %v7599_v59  ;;  %v7637_v59 = vld [vmem:[%s9467_s1 + $0xf80] sm:$0xff] }
 0x1d8   :  { %5002 = vmatpush.bf16.msra.mxu2 %v7607_v61  ;;  %v76_v61 = vld [vmem:[%s9466_s0 + $0x1e8] sm:$0xff] }
 0x1d9   :  { %5015 = vmatpush.bf16.msra.mxu3 %v7615_v62  ;;  %v7645_v62 = vld [vmem:[%s9467_s1 + $0xfc0] sm:$0xff] }
 0x1da   :  { %4977 = vmatpush.bf16.msra.mxu0 %v7590_v63  ;;  %v77_v63 = vld [vmem:[%s9466_s0 + $0x1f0] sm:$0xff] }
 0x1db   :  { %4990 = vmatpush.bf16.msra.mxu1 %v7598_v0  ;;  %v78_v0 = vld [vmem:[%s9466_s0 + $0x1f8] sm:$0xff]  ;;  %v141_v3 = vpack.c.bf16 %v77_v63, %v77_v63  ;;  %s7681_s0 = smov [#allocation2]  }
 0x1dc   :  { %5003 = vmatpush.bf16.msra.mxu2 %v7606_v1  ;;  %v139_v1 = vpack.c.bf16 %v75_v60, %v75_v60  ;;  %v142_v4 = vpack.c.bf16 %v78_v0, %v78_v0 }
 0x1dd   :  { %5016 = vmatpush.bf16.msra.mxu3 %v7614_v2  ;;  %v140_v2 = vpack.c.bf16 %v76_v61, %v76_v61 }
 0x1de   :  { %4978 = vmatpush.bf16.msra.mxu0 %v7589_v5  ;;  %v4772_v29 = vpop.f32.mrf.mxu0 }
 0x1df   :  { %4991 = vmatpush.bf16.msra.mxu1 %v7597_v6  ;;  %v4773_v30 = vadd.f32 %v4772_v29, %v9304_v57  ;;  %v4785_v33 = vpop.f32.mrf.mxu1  ;;  %v7621_v57 = vld [vmem:[%s9467_s1 + $0xf00] sm:$0xff]  ;;  %s5082_s1 = sshll.u32 %s7681_s0, 4  ;;  %s5083_s1 = int_to_ptr.vmem [resolvable:$true] %s5082_s1 }
 0x1e0   :  { %5004 = vmatpush.bf16.msra.mxu2 %v7605_v7 }
 0x1e1   :  { %5017 = vmatpush.bf16.msra.mxu3 %v7613_v8  ;;  %4979 = vmatmul.bf16.vlgmr.msra.gmra.mxu0 %v135_v17  ;;  %v4786_v36 = vadd.f32 %v4785_v33, %v4773_v30 }
 0x1e2   :  { %5023 = vmatpush.bf16.msrb.mxu0 %v7628_v9  ;;  %4992 = vmatmul.bf16.vlgmr.msra.gmra.mxu1 %v136_v19 }
 0x1e3   :  { %5036 = vmatpush.bf16.msrb.mxu1 %v7636_v12  ;;  %5005 = vmatmul.bf16.vlgmr.msra.gmra.mxu2 %v137_v18 }
 0x1e4   :  { %5049 = vmatpush.bf16.msrb.mxu2 %v7644_v15  ;;  %5018 = vmatmul.bf16.vlgmr.msra.gmra.mxu3 %v138_v20 }
 0x1e5   :  { %5062 = vmatpush.bf16.msrb.mxu3 %v7652_v16 }
 0x1e6   :  { %5024 = vmatpush.bf16.msrb.mxu0 %v7627_v21  ;;  %v4798_v41 = vpop.f32.mrf.mxu2  ;;  %v4774_v44 = vpop.f32.mrf.mxu0 }
 0x1e7   :  { %5037 = vmatpush.bf16.msrb.mxu1 %v7635_v22  ;;  %v4799_v42 = vadd.f32 %v4798_v41, %v4786_v36  ;;  %v4811_v43 = vpop.f32.mrf.mxu3  ;;  %v4787_v48 = vpop.f32.mrf.mxu1 }
 0x1e8   :  { %5050 = vmatpush.bf16.msrb.mxu2 %v7643_v23 }
 0x1e9   :  { %5063 = vmatpush.bf16.msrb.mxu3 %v7651_v24  ;;  %v4812_v45 = vadd.f32 %v4811_v43, %v4799_v42 }
 0x1ea   :  { %5025 = vmatpush.bf16.msrb.mxu0 %v7626_v25 }
 0x1eb   :  { %5038 = vmatpush.bf16.msrb.mxu1 %v7634_v26 }
 0x1ec   :  { %5051 = vmatpush.bf16.msrb.mxu2 %v7642_v27 }
 0x1ed   :  { %5064 = vmatpush.bf16.msrb.mxu3 %v7650_v28 }
 0x1ee   :  { %5026 = vmatpush.bf16.msrb.mxu0 %v7625_v31  ;;  %v4800_v55 = vpop.f32.mrf.mxu2 }
 0x1ef   :  { %5039 = vmatpush.bf16.msrb.mxu1 %v7633_v32  ;;  %v4813_v56 = vpop.f32.mrf.mxu3 }
 0x1f0   :  { %5052 = vmatpush.bf16.msrb.mxu2 %v7641_v34 }
 0x1f1   :  { %5065 = vmatpush.bf16.msrb.mxu3 %v7649_v35 }
 0x1f2   :  { %5027 = vmatpush.bf16.msrb.mxu0 %v7624_v37 }
 0x1f3   :  { %5040 = vmatpush.bf16.msrb.mxu1 %v7632_v38 }
 0x1f4   :  { %5053 = vmatpush.bf16.msrb.mxu2 %v7640_v39 }
 0x1f5   :  { %5066 = vmatpush.bf16.msrb.mxu3 %v7648_v40 }
 0x1f6   :  { %5028 = vmatpush.bf16.msrb.mxu0 %v7623_v46 }
 0x1f7   :  { %5041 = vmatpush.bf16.msrb.mxu1 %v7631_v47 }
 0x1f8   :  { %5054 = vmatpush.bf16.msrb.mxu2 %v7639_v49 }
 0x1f9   :  { %5067 = vmatpush.bf16.msrb.mxu3 %v7647_v50 }
 0x1fa   :  { %5029 = vmatpush.bf16.msrb.mxu0 %v7622_v51 }
 0x1fb   :  { %5042 = vmatpush.bf16.msrb.mxu1 %v7630_v52 }
 0x1fc   :  { %5055 = vmatpush.bf16.msrb.mxu2 %v7638_v53 }
 0x1fd   :  { %5068 = vmatpush.bf16.msrb.mxu3 %v7646_v54 }
 0x1fe   :  { %5030 = vmatpush.bf16.msrb.mxu0 %v7621_v57  ;;  %v4824_v5 = vpop.f32.mrf.mxu0 }
 0x1ff   :  { %5043 = vmatpush.bf16.msrb.mxu1 %v7629_v58  ;;  %v4825_v6 = vadd.f32 %v4824_v5, %v4812_v45  ;;  %v4837_v7 = vpop.f32.mrf.mxu1 }
 0x200   :  { %5056 = vmatpush.bf16.msrb.mxu2 %v7637_v59 }
 0x201   :  { %5069 = vmatpush.bf16.msrb.mxu3 %v7645_v62  ;;  %5031 = vmatmul.bf16.vlgmr.msrb.gmra.mxu0 %v139_v1  ;;  %v4838_v8 = vadd.f32 %v4837_v7, %v4825_v6 }
 0x202   :  { %5044 = vmatmul.bf16.vlgmr.msrb.gmra.mxu1 %v140_v2 }
 0x203   :  { %5057 = vmatmul.bf16.vlgmr.msrb.gmra.mxu2 %v141_v3 }
 0x204   :  { %5070 = vmatmul.bf16.vlgmr.msrb.gmra.mxu3 %v142_v4 }
 0x206   :  { %v4850_v9 = vpop.f32.mrf.mxu2  ;;  %v4826_v12 = vpop.f32.mrf.mxu0 }
 0x207   :  { %v4851_v10 = vadd.f32 %v4850_v9, %v4838_v8  ;;  %v4863_v11 = vpop.f32.mrf.mxu3  ;;  %v4839_v14 = vpop.f32.mrf.mxu1 }
 0x209   :  { %v4864_v13 = vadd.f32 %v4863_v11, %v4851_v10 }
 0x20e   :  { %v4852_v15 = vpop.f32.mrf.mxu2 }
 0x20f   :  { %v4865_v16 = vpop.f32.mrf.mxu3 }
 0x21e   :  { %v4876_v17 = vpop.f32.mrf.mxu0 }
 0x21f   :  { %v4877_v18 = vadd.f32 %v4876_v17, %v4864_v13  ;;  %v4889_v19 = vpop.f32.mrf.mxu1 }
 0x221   :  { %v4890_v20 = vadd.f32 %v4889_v19, %v4877_v18 }
 0x226   :  { %v4902_v21 = vpop.f32.mrf.mxu2  ;;  %v4878_v24 = vpop.f32.mrf.mxu0 }
 0x227   :  { %v4903_v22 = vadd.f32 %v4902_v21, %v4890_v20  ;;  %v4915_v23 = vpop.f32.mrf.mxu3  ;;  %v4891_v26 = vpop.f32.mrf.mxu1 }
 0x229   :  { %v4916_v25 = vadd.f32 %v4915_v23, %v4903_v22 }
 0x22e   :  { %v4904_v27 = vpop.f32.mrf.mxu2 }
 0x22f   :  { %v4917_v28 = vpop.f32.mrf.mxu3 }
 0x23e   :  { %v4928_v29 = vpop.f32.mrf.mxu0 }
 0x23f   :  { %v4941_v30 = vpop.f32.mrf.mxu1  ;;  %v4929_v40 = vadd.f32 %v4928_v29, %v4916_v25 }
 0x241   :  { %v4942_v44 = vadd.f32 %v4941_v30, %v4929_v40 }
 0x246   :  { %v4954_v31 = vpop.f32.mrf.mxu2  ;;  %v4930_v33 = vpop.f32.mrf.mxu0 }
 0x247   :  { %v4967_v32 = vpop.f32.mrf.mxu3  ;;  %v4943_v34 = vpop.f32.mrf.mxu1  ;;  %v4955_v45 = vadd.f32 %v4954_v31, %v4942_v44 }
 0x249   :  { %v4968_v48 = vadd.f32 %v4967_v32, %v4955_v45 }
 0x24e   :  { %v4956_v35 = vpop.f32.mrf.mxu2 }
 0x24f   :  { %v4969_v36 = vpop.f32.mrf.mxu3 }
 0x25e   :  { %v4980_v37 = vpop.f32.mrf.mxu0 }
 0x25f   :  { %v4993_v38 = vpop.f32.mrf.mxu1  ;;  %v4981_v49 = vadd.f32 %v4980_v37, %v4968_v48 }
 0x261   :  { %v4994_v50 = vadd.f32 %v4993_v38, %v4981_v49 }
 0x266   :  { %v5006_v39 = vpop.f32.mrf.mxu2  ;;  %v4982_v42 = vpop.f32.mrf.mxu0 }
 0x267   :  { %v5019_v41 = vpop.f32.mrf.mxu3  ;;  %v4995_v43 = vpop.f32.mrf.mxu1  ;;  %v5007_v51 = vadd.f32 %v5006_v39, %v4994_v50 }
 0x269   :  { %v5020_v52 = vadd.f32 %v5019_v41, %v5007_v51 }
 0x26e   :  { %v5008_v46 = vpop.f32.mrf.mxu2 }
 0x26f   :  { %v5021_v47 = vpop.f32.mrf.mxu3 }
 0x27e   :  { %v5032_v53 = vpop.f32.mrf.mxu0 }
 0x27f   :  { %v5045_v54 = vpop.f32.mrf.mxu1  ;;  %v5033_v55 = vadd.f32 %v5032_v53, %v5020_v52 }
 0x281   :  { %v5046_v56 = vadd.f32 %v5045_v54, %v5033_v55 }
 0x286   :  { %v5058_v57 = vpop.f32.mrf.mxu2  ;;  %v5034_v60 = vpop.f32.mrf.mxu0 }
 0x287   :  { %v5071_v58 = vpop.f32.mrf.mxu3  ;;  %v5059_v59 = vadd.f32 %v5058_v57, %v5046_v56  ;;  %v5047_v61 = vpop.f32.mrf.mxu1 }
 0x289   :  { %v5072_v62 = vadd.f32 %v5071_v58, %v5059_v59 }
 0x28b   :  { %5076 = vst.msk [vmem:[#allocation2] sm:$0xff] %vm5075_vm0, %v5072_v62 }
 0x28c   :  { %5087 = dma.vmem_to_hbm [thread:$0]  %s5083_s1, 128, %s5085_s6, [#allocation3]  }
 0x28e   :  { %v5060_v63 = vpop.f32.mrf.mxu2 }
 0x28f   :  { %v5073_v0 = vpop.f32.mrf.mxu3 }
 0x290   :  { %7679 = dma.done.wait [#allocation3], 128  }
 0x291   :  { %7680 = vsyncadd [#allocation3], 4294967168 }
 0x292   :  { %5092 = vsyncpa [#allocation3], 1 }

</bundles_post_ra>
